<compile_context>
chip_gen: v5e
topology: v5e:2x2
jax: 0.10.0
libtpu: 0.0.40
codegen_flags: <defaults>
</compile_context>

<pallas_src>
import functools

import jax
import jax.numpy as jnp
from jax import lax
from jax.experimental import pallas as pl
from jax.experimental.pallas import tpu as pltpu

LANE = 128
_VMEM_BUDGET = 40 << 20      # conservative: leaves headroom inside v7x's 64 MiB/TC


# ----------------------------------------------------------------------------
# Small helpers
# ----------------------------------------------------------------------------
def _round_up(v, m):
    return ((v + m - 1) // m) * m


def _pad_nodes(n):
    """Pad node count so row tiles of 256 (or 512 for big graphs) divide it."""
    n_p = _round_up(n, 256)
    if n_p >= 2048 and n_p % 512 != 0:
        n_p = _round_up(n, 512)
    return n_p


def _pad2(x, rows, cols):
    return jnp.pad(x, ((0, rows - x.shape[0]), (0, cols - x.shape[1])))


def _pick_tm(m, k, n, a_itemsize, b_itemsize, out_itemsize):
    """Largest row tile (multiple of 128, divides m, <=512) within VMEM budget."""
    resident = 2 * k * n * b_itemsize            # RHS (worst case double-buffered)
    tm = LANE
    t = min(512, m)
    t -= t % LANE
    while t >= LANE:
        if m % t == 0:
            need = 2 * t * k * a_itemsize + 2 * t * n * out_itemsize + resident
            if need <= _VMEM_BUDGET:
                tm = t
                break
        t -= LANE
    # v7x megacore: keep the (only) parallel axis at extent >= 2 when possible.
    if m // tm == 1 and tm % (2 * LANE) == 0:
        tm //= 2
    need = 2 * tm * k * a_itemsize + 2 * tm * n * out_itemsize + resident
    return tm, need


# ----------------------------------------------------------------------------
# Pallas kernel: row-streamed matmul, RHS resident, fused bias + activation.
#   grid = (M/tm,).  One MXU dot per row tile (full reduction), f32 result,
#   epilogue applied in-register, lane-dense store.
# ----------------------------------------------------------------------------
def _rowblock_matmul_kernel(a_ref, b_ref, bias_ref, o_ref, *,
                            activation, apply_bias, valid_cols):
    h = jnp.dot(a_ref[...], b_ref[...], preferred_element_type=jnp.float32)
    if apply_bias:
        h = h + bias_ref[...]                       # (1, n) broadcast
    if activation == "relu":
        h = jnp.maximum(h, 0.0)
    elif activation == "softmax":
        # softmax over the feature axis; mask zero-padded columns so they do
        # not contaminate the normalization.  Exact divide -> rows sum to 1.
        col = lax.broadcasted_iota(jnp.int32, h.shape, 1)
        h = jnp.where(col < valid_cols, h, -jnp.inf)
        m = jnp.max(h, axis=1, keepdims=True)
        e = jnp.exp(h - m)
        h = e / jnp.sum(e, axis=1, keepdims=True)
    o_ref[...] = h.astype(o_ref.dtype)


def _fused_matmul(a, b, bias=None, *, activation="none", valid_cols=None,
                  out_dtype=jnp.bfloat16):
    """epilogue(A @ B + bias); all dims are multiples of 128, B kept resident."""
    m, k = a.shape
    k2, n = b.shape
    assert k == k2 and m % LANE == 0 and k % LANE == 0 and n % LANE == 0
    out_itemsize = jnp.dtype(out_dtype).itemsize
    tm, need = _pick_tm(m, k, n, a.dtype.itemsize, b.dtype.itemsize, out_itemsize)
    vmem_limit = None if need <= (12 << 20) else int(min(need + (4 << 20), 100 << 20))

    apply_bias = bias is not None
    bias_row = bias if apply_bias else jnp.zeros((n,), jnp.float32)
    bias_row = bias_row.astype(jnp.float32).reshape(1, n)
    if valid_cols is None:
        valid_cols = n

    kernel = functools.partial(
        _rowblock_matmul_kernel, activation=activation,
        apply_bias=apply_bias, valid_cols=valid_cols)

    return pl.pallas_call(
        kernel,
        out_shape=jax.ShapeDtypeStruct((m, n), out_dtype),
        grid_spec=pltpu.PrefetchScalarGridSpec(
            num_scalar_prefetch=0,
            grid=(m // tm,),
            in_specs=[
                pl.BlockSpec((tm, k), lambda i: (i, 0)),   # streamed row tiles
                pl.BlockSpec((k, n), lambda i: (0, 0)),    # RHS resident, DMA'd once
                pl.BlockSpec((1, n), lambda i: (0, 0)),    # bias row, resident
            ],
            out_specs=pl.BlockSpec((tm, n), lambda i: (i, 0)),
        ),
        compiler_params=pltpu.CompilerParams(
            dimension_semantics=("parallel",),
            vmem_limit_bytes=vmem_limit),
    )(a, b, bias_row)


# ----------------------------------------------------------------------------
# One GCN layer: act(A_norm @ H @ W + b); association chosen per layer so the
# N^2-sized matmul runs over the smaller feature width.
# ----------------------------------------------------------------------------
def gcn_layer(a_norm_bf16, h_bf16, w_pad, b_pad, *, activation, valid_cols,
              out_dtype):
    f_in_p, f_out_p = w_pad.shape
    w_bf = w_pad.astype(jnp.bfloat16)
    if f_out_p <= f_in_p:
        # project first: the N^2 aggregation runs over the smaller F_out.
        xw = _fused_matmul(h_bf16, w_bf, None, activation="none",
                           out_dtype=jnp.bfloat16)
        out = _fused_matmul(a_norm_bf16, xw, b_pad, activation=activation,
                            valid_cols=valid_cols, out_dtype=out_dtype)
    else:
        # aggregate first: the N^2 matmul runs over the smaller F_in.
        ax = _fused_matmul(a_norm_bf16, h_bf16, None, activation="none",
                           out_dtype=jnp.bfloat16)
        out = _fused_matmul(ax, w_bf, b_pad, activation=activation,
                            valid_cols=valid_cols, out_dtype=out_dtype)
    return out


# ----------------------------------------------------------------------------
# Plain-JAX glue: dense symmetric-normalized adjacency built directly into the
# padded buffer.  Matches torch_geometric gcn_norm: duplicate edges scatter-ADD
# and a weight-1 self loop is added only for nodes with no existing self loop.
# ----------------------------------------------------------------------------
def build_norm_adj_padded(edge_index, num_nodes, n_pad, dtype=jnp.bfloat16):
    src = edge_index[0]
    dst = edge_index[1]
    a = jnp.zeros((n_pad, n_pad), jnp.float32)
    a = a.at[dst, src].add(1.0)                       # duplicates accumulate
    idx = jnp.arange(num_nodes)
    diag = a[idx, idx]
    a = a.at[idx, idx].add(jnp.where(diag > 0.0, 0.0, 1.0))   # remaining self loops
    deg = jnp.sum(a, axis=1)
    d_inv_sqrt = jnp.where(deg > 0.0, lax.rsqrt(deg), 0.0)
    return (d_inv_sqrt[:, None] * a * d_inv_sqrt[None, :]).astype(dtype)


# ----------------------------------------------------------------------------
# Parameter init (xavier-uniform weights, zero bias) — mirrors weights_init.
# ----------------------------------------------------------------------------
def xavier_uniform(key, fan_in, fan_out):
    limit = jnp.sqrt(6.0 / (fan_in + fan_out))
    return jax.random.uniform(key, (fan_in, fan_out), jnp.float32,
                              minval=-limit, maxval=limit)


def init_gcn_params(key, in_size, hidden_size, out_size, num_layers):
    if num_layers == 1:
        hidden_size = out_size
    sizes = [in_size]
    for i in range(num_layers):
        sizes.append(out_size if i == num_layers - 1 else hidden_size)
    params = []
    for i in range(num_layers):
        key, sub = jax.random.split(key)
        w = xavier_uniform(sub, sizes[i], sizes[i + 1])
        b = jnp.zeros((sizes[i + 1],), jnp.float32)
        params.append((w, b))
    return params


# ----------------------------------------------------------------------------
# Full forward pass (eval mode): Pallas hot path, padding handled here.
# ----------------------------------------------------------------------------
def gcn_forward(params, feature, edge_index):
    n, f_in = feature.shape
    out_size = params[-1][0].shape[1]
    n_p = _pad_nodes(n)

    a_p = build_norm_adj_padded(edge_index, n, n_p, dtype=jnp.bfloat16)
    h = _pad2(feature, n_p, _round_up(f_in, LANE)).astype(jnp.bfloat16)

    num_layers = len(params)
    for i, (w, b) in enumerate(params):
        fi, fo = w.shape
        fi_p, fo_p = _round_up(fi, LANE), _round_up(fo, LANE)
        w_p = _pad2(w, fi_p, fo_p)
        b_p = jnp.pad(b, (0, fo_p - fo))
        last = (i == num_layers - 1)
        h = gcn_layer(
            a_p, h, w_p, b_p,
            activation="softmax" if last else "relu",
            valid_cols=fo,
            out_dtype=jnp.float32 if last else jnp.bfloat16,
        )
        # dropout skipped (inference / eval mode)
    return h[:n, :out_size]


# Pure-JAX reference (f32, dense) for correctness checking.
def gcn_forward_ref(params, feature, edge_index):
    n = feature.shape[0]
    a = build_norm_adj_padded(edge_index, n, n, dtype=jnp.float32)
    h = feature
    for i, (w, b) in enumerate(params):
        h = a @ (h @ w) + b
        h = jax.nn.softmax(h, axis=1) if i == len(params) - 1 else jnp.maximum(h, 0.0)
    return h


if __name__ == "__main__":
    key = jax.random.PRNGKey(0)
    k_feat, k_edge, k_param = jax.random.split(key, 3)

    # Small synthetic graph consistent with the module's forward.
    num_nodes = 16
    in_size = 8
    hidden_size = 32
    out_size = 4
    num_layers = 2
    num_edges = 40

    feature = jax.random.normal(k_feat, (num_nodes, in_size), jnp.float32)
    edge_index = jax.random.randint(
        k_edge, (2, num_edges), minval=0, maxval=num_nodes, dtype=jnp.int32)

    params = init_gcn_params(k_param, in_size, hidden_size, out_size, num_layers)

    fwd = jax.jit(gcn_forward)
    out = jax.block_until_ready(fwd(params, feature, edge_index))

    assert out.shape == (num_nodes, out_size)
    # exact-divide softmax: rows sum to 1 to f32 accuracy
    assert jnp.allclose(jnp.sum(out, axis=1), 1.0, atol=2e-3)
    # matches the dense f32 reference within bf16 tolerance
    ref = gcn_forward_ref(params, feature, edge_index)
    assert jnp.allclose(out, ref, atol=3e-2), float(jnp.max(jnp.abs(out - ref)))
    print("KERNEL_OK")
</pallas_src>

<mosaic_0001>
module attributes {stable_mosaic.version = 11 : i64} {
  func.func @_rowblock_matmul_kernel(%arg0: i32, %arg1: memref<128x128xbf16, #tpu.memory_space<vmem>>, %arg2: memref<128x128xbf16, #tpu.memory_space<vmem>>, %arg3: memref<1x128xf32, #tpu.memory_space<vmem>>, %arg4: memref<128x128xbf16, #tpu.memory_space<vmem>>) attributes {dimension_semantics = [#tpu.dimension_semantics<parallel>], iteration_bounds = array<i64: 2>, scalar_prefetch = 0 : i64, scratch_operands = 0 : i64, tpu.core_type = #tpu.core_type<tc>, window_params = [{transform_indices = @transform_0, window_bounds = array<i64: 128, 128>}, {pipeline_mode = #tpu.pipeline_mode<synchronous>, transform_indices = @transform_1, window_bounds = array<i64: 128, 128>}, {pipeline_mode = #tpu.pipeline_mode<synchronous>, transform_indices = @transform_2, window_bounds = array<i64: 1, 128>}, {transform_indices = @transform_3, window_bounds = array<i64: 128, 128>}]} {
    %c0 = arith.constant 0 : index
    %c0_0 = arith.constant 0 : index
    %0 = vector.load %arg1[%c0, %c0_0] : memref<128x128xbf16, #tpu.memory_space<vmem>>, vector<128x128xbf16>
    %c0_1 = arith.constant 0 : index
    %c0_2 = arith.constant 0 : index
    %1 = vector.load %arg2[%c0_1, %c0_2] : memref<128x128xbf16, #tpu.memory_space<vmem>>, vector<128x128xbf16>
    %cst = arith.constant dense<0.000000e+00> : vector<128x128xf32>
    %2 = tpu.matmul %0, %1, %cst {dimension_numbers = #tpu.dot_dimension_numbers<[1], [0], [0], [1], [0, 0, 1, 1], [], []>} : vector<128x128xbf16>, vector<128x128xbf16>, vector<128x128xf32> -> vector<128x128xf32>
    %3 = arith.truncf %2 : vector<128x128xf32> to vector<128x128xbf16>
    %c0_3 = arith.constant 0 : index
    %c0_4 = arith.constant 0 : index
    %4 = vector.load %arg4[%c0_3, %c0_4] : memref<128x128xbf16, #tpu.memory_space<vmem>>, vector<128x128xbf16>
    tpu.vector_store %arg4[%c0_3, %c0_4], %3 {strides = array<i32>} : memref<128x128xbf16, #tpu.memory_space<vmem>>, vector<128x128xbf16>,
    return
  }
  func.func @transform_0(%arg0: i32) -> (i32, i32) {
    %c0_i32 = arith.constant 0 : i32
    %c0_i32_0 = arith.constant 0 : i32
    return %arg0, %c0_i32 : i32, i32
  }
  func.func @transform_1(%arg0: i32) -> (i32, i32) {
    %c0_i32 = arith.constant 0 : i32
    %c0_i32_0 = arith.constant 0 : i32
    %c0_i32_1 = arith.constant 0 : i32
    return %c0_i32, %c0_i32_0 : i32, i32
  }
  func.func @transform_2(%arg0: i32) -> (i32, i32) {
    %c0_i32 = arith.constant 0 : i32
    %c0_i32_0 = arith.constant 0 : i32
    %c0_i32_1 = arith.constant 0 : i32
    return %c0_i32, %c0_i32_0 : i32, i32
  }
  func.func @transform_3(%arg0: i32) -> (i32, i32) {
    %c0_i32 = arith.constant 0 : i32
    %c0_i32_0 = arith.constant 0 : i32
    return %arg0, %c0_i32 : i32, i32
  }
}

module attributes {stable_mosaic.version = 11 : i64} {
  func.func @_rowblock_matmul_kernel(%arg0: i32, %arg1: memref<128x256xbf16, #tpu.memory_space<vmem>>, %arg2: memref<256x128xbf16, #tpu.memory_space<vmem>>, %arg3: memref<1x128xf32, #tpu.memory_space<vmem>>, %arg4: memref<128x128xbf16, #tpu.memory_space<vmem>>) attributes {dimension_semantics = [#tpu.dimension_semantics<parallel>], iteration_bounds = array<i64: 2>, scalar_prefetch = 0 : i64, scratch_operands = 0 : i64, tpu.core_type = #tpu.core_type<tc>, window_params = [{transform_indices = @transform_0, window_bounds = array<i64: 128, 256>}, {pipeline_mode = #tpu.pipeline_mode<synchronous>, transform_indices = @transform_1, window_bounds = array<i64: 256, 128>}, {pipeline_mode = #tpu.pipeline_mode<synchronous>, transform_indices = @transform_2, window_bounds = array<i64: 1, 128>}, {transform_indices = @transform_3, window_bounds = array<i64: 128, 128>}]} {
    %c0 = arith.constant 0 : index
    %c0_0 = arith.constant 0 : index
    %0 = vector.load %arg1[%c0, %c0_0] : memref<128x256xbf16, #tpu.memory_space<vmem>>, vector<128x256xbf16>
    %c0_1 = arith.constant 0 : index
    %c0_2 = arith.constant 0 : index
    %1 = vector.load %arg2[%c0_1, %c0_2] : memref<256x128xbf16, #tpu.memory_space<vmem>>, vector<256x128xbf16>
    %cst = arith.constant dense<0.000000e+00> : vector<128x128xf32>
    %2 = tpu.matmul %0, %1, %cst {dimension_numbers = #tpu.dot_dimension_numbers<[1], [0], [0], [1], [0, 0, 1, 1], [], []>} : vector<128x256xbf16>, vector<256x128xbf16>, vector<128x128xf32> -> vector<128x128xf32>
    %c0_3 = arith.constant 0 : index
    %c0_4 = arith.constant 0 : index
    %3 = vector.load %arg3[%c0_3, %c0_4] : memref<1x128xf32, #tpu.memory_space<vmem>>, vector<1x128xf32>
    %4 = vector.broadcast %3 : vector<1x128xf32> to vector<128x128xf32>
    %5 = arith.addf %2, %4 : vector<128x128xf32>
    %cst_5 = arith.constant 0.000000e+00 : f32
    %6 = vector.broadcast %cst_5 : f32 to vector<128x128xf32>
    %7 = arith.maximumf %5, %6 : vector<128x128xf32>
    %8 = arith.truncf %7 : vector<128x128xf32> to vector<128x128xbf16>
    %c0_6 = arith.constant 0 : index
    %c0_7 = arith.constant 0 : index
    %9 = vector.load %arg4[%c0_6, %c0_7] : memref<128x128xbf16, #tpu.memory_space<vmem>>, vector<128x128xbf16>
    tpu.vector_store %arg4[%c0_6, %c0_7], %8 {strides = array<i32>} : memref<128x128xbf16, #tpu.memory_space<vmem>>, vector<128x128xbf16>,
    return
  }
  func.func @transform_0(%arg0: i32) -> (i32, i32) {
    %c0_i32 = arith.constant 0 : i32
    %c0_i32_0 = arith.constant 0 : i32
    return %arg0, %c0_i32 : i32, i32
  }
  func.func @transform_1(%arg0: i32) -> (i32, i32) {
    %c0_i32 = arith.constant 0 : i32
    %c0_i32_0 = arith.constant 0 : i32
    %c0_i32_1 = arith.constant 0 : i32
    return %c0_i32, %c0_i32_0 : i32, i32
  }
  func.func @transform_2(%arg0: i32) -> (i32, i32) {
    %c0_i32 = arith.constant 0 : i32
    %c0_i32_0 = arith.constant 0 : i32
    %c0_i32_1 = arith.constant 0 : i32
    return %c0_i32, %c0_i32_0 : i32, i32
  }
  func.func @transform_3(%arg0: i32) -> (i32, i32) {
    %c0_i32 = arith.constant 0 : i32
    %c0_i32_0 = arith.constant 0 : i32
    return %arg0, %c0_i32 : i32, i32
  }
}

module attributes {stable_mosaic.version = 11 : i64} {
  func.func @_rowblock_matmul_kernel(%arg0: i32, %arg1: memref<128x256xbf16, #tpu.memory_space<vmem>>, %arg2: memref<256x128xbf16, #tpu.memory_space<vmem>>, %arg3: memref<1x128xf32, #tpu.memory_space<vmem>>, %arg4: memref<128x128xf32, #tpu.memory_space<vmem>>) attributes {dimension_semantics = [#tpu.dimension_semantics<parallel>], iteration_bounds = array<i64: 2>, scalar_prefetch = 0 : i64, scratch_operands = 0 : i64, tpu.core_type = #tpu.core_type<tc>, window_params = [{transform_indices = @transform_0, window_bounds = array<i64: 128, 256>}, {pipeline_mode = #tpu.pipeline_mode<synchronous>, transform_indices = @transform_1, window_bounds = array<i64: 256, 128>}, {pipeline_mode = #tpu.pipeline_mode<synchronous>, transform_indices = @transform_2, window_bounds = array<i64: 1, 128>}, {transform_indices = @transform_3, window_bounds = array<i64: 128, 128>}]} {
    %c0 = arith.constant 0 : index
    %c0_0 = arith.constant 0 : index
    %0 = vector.load %arg1[%c0, %c0_0] : memref<128x256xbf16, #tpu.memory_space<vmem>>, vector<128x256xbf16>
    %c0_1 = arith.constant 0 : index
    %c0_2 = arith.constant 0 : index
    %1 = vector.load %arg2[%c0_1, %c0_2] : memref<256x128xbf16, #tpu.memory_space<vmem>>, vector<256x128xbf16>
    %cst = arith.constant dense<0.000000e+00> : vector<128x128xf32>
    %2 = tpu.matmul %0, %1, %cst {dimension_numbers = #tpu.dot_dimension_numbers<[1], [0], [0], [1], [0, 0, 1, 1], [], []>} : vector<128x256xbf16>, vector<256x128xbf16>, vector<128x128xf32> -> vector<128x128xf32>
    %c0_3 = arith.constant 0 : index
    %c0_4 = arith.constant 0 : index
    %3 = vector.load %arg3[%c0_3, %c0_4] : memref<1x128xf32, #tpu.memory_space<vmem>>, vector<1x128xf32>
    %4 = vector.broadcast %3 : vector<1x128xf32> to vector<128x128xf32>
    %5 = arith.addf %2, %4 : vector<128x128xf32>
    %6 = tpu.iota {dimensions = array<i32: 1>} : vector<128x128xi32>
    %c4_i32 = arith.constant 4 : i32
    %7 = vector.broadcast %c4_i32 : i32 to vector<128x128xi32>
    %8 = arith.cmpi slt, %6, %7 : vector<128x128xi32>
    %cst_5 = arith.constant 0xFF800000 : f32
    %9 = vector.broadcast %cst_5 : f32 to vector<128x128xf32>
    %10 = arith.select %8, %5, %9 : vector<128x128xi1>, vector<128x128xf32>
    %cst_6 = arith.constant dense<0xFF800000> : vector<128xf32>
    %11 = vector.multi_reduction <maximumf>, %10, %cst_6 [1] : vector<128x128xf32> to vector<128xf32>
    %12 = vector.shape_cast %11 : vector<128xf32> to vector<128x1xf32>
    %13 = vector.broadcast %12 : vector<128x1xf32> to vector<128x128xf32>
    %14 = arith.subf %10, %13 : vector<128x128xf32>
    %15 = math.exp %14 : vector<128x128xf32>
    %cst_7 = arith.constant dense<0.000000e+00> : vector<128xf32>
    %16 = vector.multi_reduction <add>, %15, %cst_7 [1] : vector<128x128xf32> to vector<128xf32>
    %17 = vector.shape_cast %16 : vector<128xf32> to vector<128x1xf32>
    %18 = vector.broadcast %17 : vector<128x1xf32> to vector<128x128xf32>
    %19 = arith.divf %15, %18 : vector<128x128xf32>
    %c0_8 = arith.constant 0 : index
    %c0_9 = arith.constant 0 : index
    %20 = vector.load %arg4[%c0_8, %c0_9] : memref<128x128xf32, #tpu.memory_space<vmem>>, vector<128x128xf32>
    tpu.vector_store %arg4[%c0_8, %c0_9], %19 {strides = array<i32>} : memref<128x128xf32, #tpu.memory_space<vmem>>, vector<128x128xf32>,
    return
  }
  func.func @transform_0(%arg0: i32) -> (i32, i32) {
    %c0_i32 = arith.constant 0 : i32
    %c0_i32_0 = arith.constant 0 : i32
    return %arg0, %c0_i32 : i32, i32
  }
  func.func @transform_1(%arg0: i32) -> (i32, i32) {
    %c0_i32 = arith.constant 0 : i32
    %c0_i32_0 = arith.constant 0 : i32
    %c0_i32_1 = arith.constant 0 : i32
    return %c0_i32, %c0_i32_0 : i32, i32
  }
  func.func @transform_2(%arg0: i32) -> (i32, i32) {
    %c0_i32 = arith.constant 0 : i32
    %c0_i32_0 = arith.constant 0 : i32
    %c0_i32_1 = arith.constant 0 : i32
    return %c0_i32, %c0_i32_0 : i32, i32
  }
  func.func @transform_3(%arg0: i32) -> (i32, i32) {
    %c0_i32 = arith.constant 0 : i32
    %c0_i32_0 = arith.constant 0 : i32
    return %arg0, %c0_i32 : i32, i32
  }
}

</mosaic_0001>

<bundles_post_ra>
// kernel: gcn_forward.4
= control target key start
LH: loop header
LB: loop body
LE: loop exit
PB: predicated region body
PF: predicated region fallthrough
CT: control target
= control target key end

     0   :  { %s637_s12 = smov 0   ;;  %s685_s0 = inlined_call_operand.vmem [shape: bf16[256,128], index: 0, kind: input, shape index: {}]   ;;  %s686_s1 = inlined_call_operand.vmem [shape: bf16[128,128], index: 1, kind: input, shape index: {}]   ;;  %s687_s2 = inlined_call_operand.vmem [shape: f32[1,128], index: 2, kind: input, shape index: {}]   ;;  %s688_s3 = inlined_call_operand.vmem [shape: bf16[256,128], index: 3, kind: output, shape index: {}]  }
   0x1 LB: > { %s439_s13 = sadd.s32 4294967295, %s615_s12   ;;  %p443_p0 = scmp.ge.s32.totalorder %s615_s12, 1  ;;  %s615_s12 = sphi %s637_s12, %s13_s12  }
   0x2   : > { %p138_p1 = scmp.lt.s32.totalorder %s615_s12, 3 }
   0x4   : > { %p139_p2 = pnand %p443_p0, %p138_p1 }
   0x5   : > { %s444_s21 = sshll.u32 (!%p139_p2), %s439_s13, 4 }
   0x6   : > { %142 = sbr.rel (%p139_p2) target bundleno = 204 (0xcc), region = 32  ;;  %p163_p3 = scmp.lt.s32.totalorder (!%p139_p2), %s444_s21, 31 }
   0xb   : > { %v529_v0 = vld [vmem:[%s686_s1 + $0x38] sm:$0xff]  ;;  %v528_v1 = vld [vmem:[%s686_s1 + $0x30] sm:$0xff]  ;;  %v527_v2 = vld [vmem:[%s686_s1 + $0x28] sm:$0xff]  ;;  %s690_s21 = smov (!%p163_p3, %s444_s21), 31 }
   0xc   : > { %302 = vmatpush.bf16.msra.mxu0 %v529_v0  ;;  %577 = vmatpush.bf16.msra.mxu1 %v529_v0  ;;  %v526_v3 = vld [vmem:[%s686_s1 + $0x20] sm:$0xff]  ;;  %v525_v4 = vld [vmem:[%s686_s1 + $0x18] sm:$0xff]  ;;  %v524_v5 = vld [vmem:[%s686_s1 + $0x10] sm:$0xff]  ;;  %s445_s28 = sshll.u32 %s690_s21, 2 }
   0xd   : > { %578 = vmatpush.bf16.msra.mxu2 %v529_v0  ;;  %579 = vmatpush.bf16.msra.mxu3 %v529_v0  ;;  %v523_v6 = vld [vmem:[%s686_s1 + $0x8] sm:$0xff]  ;;  %v522_v7 = vld [vmem:[%s686_s1] sm:$0xff]  ;;  %s166_s6 = scalar_lea.vmem %s685_s0, %s445_s28  ;;  %s172_s9 = scalar_lea.vmem %s688_s3, %s445_s28 }
   0xe   : > { %v514_v8 = vld [vmem:[%s166_s6] sm:$0xff]  ;;  %v516_v9 = vld [vmem:[%s166_s6 + $0x10] sm:$0xff]  ;;  %v515_v12 = vld [vmem:[%s166_s6 + $0x8] sm:$0xff] }
   0xf   : > { %v518_v10 = vld [vmem:[%s166_s6 + $0x20] sm:$0xff]  ;;  %v520_v11 = vld [vmem:[%s166_s6 + $0x30] sm:$0xff]  ;;  %v517_v13 = vld [vmem:[%s166_s6 + $0x18] sm:$0xff] }
  0x10   : > { %303 = vmatpush.bf16.msra.mxu0 %v528_v1  ;;  %580 = vmatpush.bf16.msra.mxu1 %v528_v1  ;;  %v519_v14 = vld [vmem:[%s166_s6 + $0x28] sm:$0xff]  ;;  %v521_v15 = vld [vmem:[%s166_s6 + $0x38] sm:$0xff] }
  0x11   : > { %581 = vmatpush.bf16.msra.mxu2 %v528_v1  ;;  %582 = vmatpush.bf16.msra.mxu3 %v528_v1 }
  0x14   : > { %304 = vmatpush.bf16.msra.mxu0 %v527_v2  ;;  %583 = vmatpush.bf16.msra.mxu1 %v527_v2 }
  0x15   : > { %584 = vmatpush.bf16.msra.mxu2 %v527_v2  ;;  %585 = vmatpush.bf16.msra.mxu3 %v527_v2 }
  0x18   : > { %305 = vmatpush.bf16.msra.mxu0 %v526_v3  ;;  %586 = vmatpush.bf16.msra.mxu1 %v526_v3 }
  0x19   : > { %587 = vmatpush.bf16.msra.mxu2 %v526_v3  ;;  %588 = vmatpush.bf16.msra.mxu3 %v526_v3 }
  0x1c   : > { %306 = vmatpush.bf16.msra.mxu0 %v525_v4  ;;  %589 = vmatpush.bf16.msra.mxu1 %v525_v4 }
  0x1d   : > { %590 = vmatpush.bf16.msra.mxu2 %v525_v4  ;;  %591 = vmatpush.bf16.msra.mxu3 %v525_v4 }
  0x20   : > { %307 = vmatpush.bf16.msra.mxu0 %v524_v5  ;;  %592 = vmatpush.bf16.msra.mxu1 %v524_v5 }
  0x21   : > { %593 = vmatpush.bf16.msra.mxu2 %v524_v5  ;;  %594 = vmatpush.bf16.msra.mxu3 %v524_v5 }
  0x24   : > { %308 = vmatpush.bf16.msra.mxu0 %v523_v6  ;;  %595 = vmatpush.bf16.msra.mxu1 %v523_v6 }
  0x25   : > { %596 = vmatpush.bf16.msra.mxu2 %v523_v6  ;;  %597 = vmatpush.bf16.msra.mxu3 %v523_v6 }
  0x28   : > { %309 = vmatpush.bf16.msra.mxu0 %v522_v7  ;;  %598 = vmatpush.bf16.msra.mxu1 %v522_v7 }
  0x29   : > { %599 = vmatpush.bf16.msra.mxu2 %v522_v7  ;;  %600 = vmatpush.bf16.msra.mxu3 %v522_v7 }
  0x2b   : > { %310 = vmatmul.bf16.vlgmr.msra.gmra.mxu0 %v514_v8  ;;  %320 = vmatmul.bf16.vlgmr.msra.gmra.mxu1 %v516_v9 }
  0x2c   : > { %330 = vmatmul.bf16.vlgmr.msra.gmra.mxu2 %v518_v10  ;;  %340 = vmatmul.bf16.vlgmr.msra.gmra.mxu3 %v520_v11 }
  0x3b   : > { %315 = vmatmul.bf16.gmra.mxu0 %v515_v12  ;;  %325 = vmatmul.bf16.gmra.mxu1 %v517_v13 }
  0x3c   : > { %335 = vmatmul.bf16.gmra.mxu2 %v519_v14  ;;  %345 = vmatmul.bf16.gmra.mxu3 %v521_v15 }
  0xa8   : > { %v311_v16 = vpop.f32.mrf.mxu0  ;;  %v321_v17 = vpop.f32.mrf.mxu1 }
  0xaf   : > { %v331_v18 = vpop.f32.mrf.mxu2  ;;  %v341_v19 = vpop.f32.mrf.mxu3 }
  0xb0   : > { %v313_v20 = vpop.f32.mrf.mxu0  ;;  %v323_v21 = vpop.f32.mrf.mxu1 }
  0xb1   : > { %v533_v22 = vpack.c.bf16 %v313_v20, %v311_v16  ;;  %v543_v23 = vpack.c.bf16 %v323_v21, %v321_v17 }
  0xb3   : > { %534 = vst [vmem:[%s172_s9] sm:$0xff] %v533_v22  }
  0xb4   : > { %571 = vst [vmem:[%s172_s9 + $0x10] sm:$0xff] %v543_v23  }
  0xb7   : > { %v333_v24 = vpop.f32.mrf.mxu2  ;;  %v343_v25 = vpop.f32.mrf.mxu3 }
  0xb8   : > { %v553_v26 = vpack.c.bf16 %v333_v24, %v331_v18  ;;  %v563_v27 = vpack.c.bf16 %v343_v25, %v341_v19  ;;  %v316_v28 = vpop.f32.mrf.mxu0  ;;  %v326_v29 = vpop.f32.mrf.mxu1 }
  0xba   : > { %573 = vst [vmem:[%s172_s9 + $0x20] sm:$0xff] %v553_v26  }
  0xbb   : > { %575 = vst [vmem:[%s172_s9 + $0x30] sm:$0xff] %v563_v27  }
  0xbf   : > { %v336_v30 = vpop.f32.mrf.mxu2  ;;  %v346_v31 = vpop.f32.mrf.mxu3 }
  0xc0   : > { %v318_v32 = vpop.f32.mrf.mxu0  ;;  %v328_v33 = vpop.f32.mrf.mxu1 }
  0xc1   : > { %v538_v34 = vpack.c.bf16 %v318_v32, %v316_v28  ;;  %v548_v35 = vpack.c.bf16 %v328_v33, %v326_v29 }
  0xc3   : > { %570 = vst [vmem:[%s172_s9 + $0x8] sm:$0xff] %v538_v34  }
  0xc4   : > { %572 = vst [vmem:[%s172_s9 + $0x18] sm:$0xff] %v548_v35  }
  0xc7   : > { %v338_v36 = vpop.f32.mrf.mxu2  ;;  %v348_v37 = vpop.f32.mrf.mxu3 }
  0xc8   : > { %v558_v38 = vpack.c.bf16 %v338_v36, %v336_v30  ;;  %v568_v39 = vpack.c.bf16 %v348_v37, %v346_v31 }
  0xca   : > { %574 = vst [vmem:[%s172_s9 + $0x28] sm:$0xff] %v558_v38  }
  0xcb   : > { %576 = vst [vmem:[%s172_s9 + $0x38] sm:$0xff] %v568_v39  }
  0xcc PF: > { %s13_s12 = sadd.s32 1, %s615_s12  }
  0xcd   : > { %p10_p4 = scmp.ge.s32.totalorder %s13_s12, 4  }
  0xcf   :  { %12 = sbr.rel (!%p10_p4) target bundleno = 1 (0x1), region = 62 }

// kernel: gcn_forward.5
= control target key start
LH: loop header
LB: loop body
LE: loop exit
PB: predicated region body
PF: predicated region fallthrough
CT: control target
= control target key end

     0   :  { %s880_s12 = smov 0   ;;  %s1014_s0 = inlined_call_operand.vmem [shape: bf16[256,256], index: 0, kind: input, shape index: {}]   ;;  %s1015_s1 = inlined_call_operand.vmem [shape: bf16[256,128], index: 1, kind: input, shape index: {}]   ;;  %s1016_s2 = inlined_call_operand.vmem [shape: f32[1,128], index: 2, kind: input, shape index: {}]   ;;  %s1017_s3 = inlined_call_operand.vmem [shape: bf16[256,128], index: 3, kind: output, shape index: {}]  }
   0x1 LB: > { %s607_s13 = sadd.s32 4294967295, %s858_s12   ;;  %p611_p0 = scmp.ge.s32.totalorder %s858_s12, 1  ;;  %s858_s12 = sphi %s880_s12, %s13_s12  }
   0x2   : > { %p139_p1 = scmp.lt.s32.totalorder %s858_s12, 3 }
   0x4   : > { %p140_p2 = pnand %p611_p0, %p139_p1 }
   0x5   : > { %s612_s26 = sshll.u32 (!%p140_p2), %s607_s13, 4 }
   0x6   : > { %143 = sbr.rel (%p140_p2) target bundleno = 240 (0xf0), region = 32  ;;  %p165_p3 = scmp.lt.s32.totalorder (!%p140_p2), %s612_s26, 31 }
   0xb   : > { %v771_v0 = vld [vmem:[%s1015_s1 + $0x38] sm:$0xff]  ;;  %v770_v2 = vld [vmem:[%s1015_s1 + $0x30] sm:$0xff]  ;;  %v769_v4 = vld [vmem:[%s1015_s1 + $0x28] sm:$0xff]  ;;  %s1019_s26 = smov (!%p165_p3, %s612_s26), 31 }
   0xc   : > { %v779_v1 = vld [vmem:[%s1015_s1 + $0x78] sm:$0xff]  ;;  %405 = vmatpush.bf16.msra.mxu0 %v771_v0  ;;  %827 = vmatpush.bf16.msra.mxu2 %v771_v0  ;;  %v778_v3 = vld [vmem:[%s1015_s1 + $0x70] sm:$0xff]  ;;  %v777_v5 = vld [vmem:[%s1015_s1 + $0x68] sm:$0xff]  ;;  %s747_s13 = sshll.u32 %s1019_s26, 3  ;;  %s616_s28 = sshll.u32 %s1019_s26, 2 }
   0xd   : > { %454 = vmatpush.bf16.msra.mxu1 %v779_v1  ;;  %835 = vmatpush.bf16.msra.mxu3 %v779_v1  ;;  %v768_v6 = vld [vmem:[%s1015_s1 + $0x20] sm:$0xff]  ;;  %v767_v8 = vld [vmem:[%s1015_s1 + $0x18] sm:$0xff]  ;;  %v766_v10 = vld [vmem:[%s1015_s1 + $0x10] sm:$0xff]  ;;  %s933_s18 = scalar_lea.vmem %s1014_s0, %s747_s13  ;;  %s988_s4 = scalar_lea.vmem %s1017_s3, %s616_s28 }
   0xe   : > { %v776_v7 = vld [vmem:[%s1015_s1 + $0x60] sm:$0xff]  ;;  %v775_v9 = vld [vmem:[%s1015_s1 + $0x58] sm:$0xff]  ;;  %v774_v11 = vld [vmem:[%s1015_s1 + $0x50] sm:$0xff] }
   0xf   : > { %v765_v12 = vld [vmem:[%s1015_s1 + $0x8] sm:$0xff]  ;;  %v764_v14 = vld [vmem:[%s1015_s1] sm:$0xff]  ;;  %v627_v28 = vld [vmem:[%s933_s18 + $0x10] sm:$0xf] }
  0x10   : > { %406 = vmatpush.bf16.msra.mxu0 %v770_v2  ;;  %828 = vmatpush.bf16.msra.mxu2 %v770_v2  ;;  %v773_v13 = vld [vmem:[%s1015_s1 + $0x48] sm:$0xff]  ;;  %v772_v15 = vld [vmem:[%s1015_s1 + $0x40] sm:$0xff]  ;;  %v751_v29 = vld [vmem:[%s933_s18 + $0x14] sm:$0xf0] }
  0x11   : > { %455 = vmatpush.bf16.msra.mxu1 %v778_v3  ;;  %836 = vmatpush.bf16.msra.mxu3 %v778_v3  ;;  %v619_v16 = vld [vmem:[%s933_s18] sm:$0xf]  ;;  %v749_v17 = vld [vmem:[%s933_s18 + $0x4] sm:$0xf0]  ;;  %v748_v20 = vld [vmem:[%s933_s18 + $0x4] sm:$0xf]  ;;  %v628_v36 = vor.u32 %v751_v29, %v627_v28 }
  0x12   : > { %v651_v18 = vld [vmem:[%s933_s18 + $0x40] sm:$0xf]  ;;  %v757_v19 = vld [vmem:[%s933_s18 + $0x44] sm:$0xf0]  ;;  %v621_v21 = vld [vmem:[%s933_s18 + $0x8] sm:$0xf0]  ;;  %v620_v24 = vor.u32 %v749_v17, %v619_v16 }
  0x13   : > { %v756_v22 = vld [vmem:[%s933_s18 + $0x44] sm:$0xf]  ;;  %v653_v23 = vld [vmem:[%s933_s18 + $0x48] sm:$0xf0]  ;;  %v652_v25 = vor.u32 %v757_v19, %v651_v18  ;;  %v624_v26 = vor.u32 %v748_v20, %v621_v21  ;;  %v659_v30 = vld [vmem:[%s933_s18 + $0x50] sm:$0xf] }
  0x14   : > { %407 = vmatpush.bf16.msra.mxu0 %v769_v4  ;;  %829 = vmatpush.bf16.msra.mxu2 %v769_v4  ;;  %v656_v27 = vor.u32 %v756_v22, %v653_v23  ;;  %v759_v31 = vld [vmem:[%s933_s18 + $0x54] sm:$0xf0]  ;;  %v750_v32 = vld [vmem:[%s933_s18 + $0x14] sm:$0xf]  ;;  %v629_v33 = vld [vmem:[%s933_s18 + $0x18] sm:$0xf0] }
  0x15   : > { %456 = vmatpush.bf16.msra.mxu1 %v777_v5  ;;  %837 = vmatpush.bf16.msra.mxu3 %v777_v5  ;;  %v758_v34 = vld [vmem:[%s933_s18 + $0x54] sm:$0xf]  ;;  %v661_v35 = vld [vmem:[%s933_s18 + $0x58] sm:$0xf0]  ;;  %v660_v37 = vor.u32 %v759_v31, %v659_v30  ;;  %v632_v38 = vor.u32 %v750_v32, %v629_v33  ;;  %v635_v40 = vld [vmem:[%s933_s18 + $0x20] sm:$0xf] }
  0x16   : > { %v664_v39 = vor.u32 %v758_v34, %v661_v35  ;;  %v753_v41 = vld [vmem:[%s933_s18 + $0x24] sm:$0xf0]  ;;  %v667_v42 = vld [vmem:[%s933_s18 + $0x60] sm:$0xf]  ;;  %v752_v44 = vld [vmem:[%s933_s18 + $0x24] sm:$0xf] }
  0x17   : > { %v761_v43 = vld [vmem:[%s933_s18 + $0x64] sm:$0xf0]  ;;  %v637_v45 = vld [vmem:[%s933_s18 + $0x28] sm:$0xf0]  ;;  %v760_v46 = vld [vmem:[%s933_s18 + $0x64] sm:$0xf]  ;;  %v636_v48 = vor.u32 %v753_v41, %v635_v40 }
  0x18   : > { %408 = vmatpush.bf16.msra.mxu0 %v768_v6  ;;  %830 = vmatpush.bf16.msra.mxu2 %v768_v6  ;;  %v669_v47 = vld [vmem:[%s933_s18 + $0x68] sm:$0xf0]  ;;  %v668_v49 = vor.u32 %v761_v43, %v667_v42  ;;  %v640_v50 = vor.u32 %v752_v44, %v637_v45  ;;  %v643_v52 = vld [vmem:[%s933_s18 + $0x30] sm:$0xf]  ;;  %v755_v53 = vld [vmem:[%s933_s18 + $0x34] sm:$0xf0] }
  0x19   : > { %457 = vmatpush.bf16.msra.mxu1 %v776_v7  ;;  %838 = vmatpush.bf16.msra.mxu3 %v776_v7  ;;  %v672_v51 = vor.u32 %v760_v46, %v669_v47  ;;  %v675_v54 = vld [vmem:[%s933_s18 + $0x70] sm:$0xf]  ;;  %v763_v55 = vld [vmem:[%s933_s18 + $0x74] sm:$0xf0]  ;;  %v754_v56 = vld [vmem:[%s933_s18 + $0x34] sm:$0xf]  ;;  %v644_v60 = vor.u32 %v755_v53, %v643_v52 }
  0x1a   : > { %v645_v57 = vld [vmem:[%s933_s18 + $0x38] sm:$0xf0]  ;;  %v762_v58 = vld [vmem:[%s933_s18 + $0x74] sm:$0xf]  ;;  %v676_v61 = vor.u32 %v763_v55, %v675_v54  ;;  %v979_v1 = vld [vmem:[%s1016_s2] ss:$0 sm:$0xff] }
  0x1b   : > { %v677_v59 = vld [vmem:[%s933_s18 + $0x78] sm:$0xf0]  ;;  %v648_v62 = vor.u32 %v754_v56, %v645_v57 }
  0x1c   : > { %409 = vmatpush.bf16.msra.mxu0 %v767_v8  ;;  %831 = vmatpush.bf16.msra.mxu2 %v767_v8  ;;  %v680_v63 = vor.u32 %v762_v58, %v677_v59 }
  0x1d   : > { %458 = vmatpush.bf16.msra.mxu1 %v775_v9  ;;  %839 = vmatpush.bf16.msra.mxu3 %v775_v9 }
  0x20   : > { %410 = vmatpush.bf16.msra.mxu0 %v766_v10  ;;  %832 = vmatpush.bf16.msra.mxu2 %v766_v10 }
  0x21   : > { %459 = vmatpush.bf16.msra.mxu1 %v774_v11  ;;  %840 = vmatpush.bf16.msra.mxu3 %v774_v11 }
  0x24   : > { %411 = vmatpush.bf16.msra.mxu0 %v765_v12  ;;  %833 = vmatpush.bf16.msra.mxu2 %v765_v12 }
  0x25   : > { %460 = vmatpush.bf16.msra.mxu1 %v773_v13  ;;  %841 = vmatpush.bf16.msra.mxu3 %v773_v13 }
  0x28   : > { %412 = vmatpush.bf16.msra.mxu0 %v764_v14  ;;  %834 = vmatpush.bf16.msra.mxu2 %v764_v14 }
  0x29   : > { %461 = vmatpush.bf16.msra.mxu1 %v772_v15  ;;  %842 = vmatpush.bf16.msra.mxu3 %v772_v15 }
  0x2b   : > { %413 = vmatmul.bf16.vlgmr.msra.gmra.mxu0 %v620_v24  ;;  %433 = vmatmul.bf16.vlgmr.msra.gmra.mxu2 %v652_v25 }
  0x2c   : > { %462 = vmatmul.bf16.vlgmr.msra.gmra.mxu1 %v624_v26  ;;  %482 = vmatmul.bf16.vlgmr.msra.gmra.mxu3 %v656_v27 }
  0x3b   : > { %418 = vmatmul.bf16.gmra.mxu0 %v628_v36  ;;  %438 = vmatmul.bf16.gmra.mxu2 %v660_v37 }
  0x3c   : > { %467 = vmatmul.bf16.gmra.mxu1 %v632_v38  ;;  %487 = vmatmul.bf16.gmra.mxu3 %v664_v39 }
  0x4b   : > { %423 = vmatmul.bf16.gmra.mxu0 %v636_v48  ;;  %443 = vmatmul.bf16.gmra.mxu2 %v668_v49 }
  0x4c   : > { %472 = vmatmul.bf16.gmra.mxu1 %v640_v50  ;;  %492 = vmatmul.bf16.gmra.mxu3 %v672_v51 }
  0x5b   : > { %428 = vmatmul.bf16.gmra.mxu0 %v644_v60  ;;  %448 = vmatmul.bf16.gmra.mxu2 %v676_v61 }
  0x5c   : > { %477 = vmatmul.bf16.gmra.mxu1 %v648_v62  ;;  %497 = vmatmul.bf16.gmra.mxu3 %v680_v63 }
  0xa8   : > { %v414_v0 = vpop.f32.mrf.mxu0 }
  0xa9   : > { %v463_v2 = vpop.f32.mrf.mxu1  ;;  %v415_v3 = vadd.f32 %v979_v1, %v414_v0 }
  0xab   : > { %v464_v7 = vadd.f32 %v463_v2, %v415_v3 }
  0xad   : > { %v503_v12 = vmax.f32 %v464_v7, 0.0 }
  0xae   : > { %v434_v4 = vpop.f32.mrf.mxu2 }
  0xaf   : > { %v483_v5 = vpop.f32.mrf.mxu3  ;;  %v435_v10 = vadd.f32 %v979_v1, %v434_v4 }
  0xb0   : > { %v416_v6 = vpop.f32.mrf.mxu0 }
  0xb1   : > { %v417_v8 = vadd.f32 %v979_v1, %v416_v6  ;;  %v465_v9 = vpop.f32.mrf.mxu1  ;;  %v484_v15 = vadd.f32 %v483_v5, %v435_v10 }
  0xb3   : > { %v466_v11 = vadd.f32 %v465_v9, %v417_v8  ;;  %v511_v22 = vmax.f32 %v484_v15, 0.0 }
  0xb5   : > { %v504_v13 = vmax.f32 %v466_v11, 0.0 }
  0xb6   : > { %v436_v14 = vpop.f32.mrf.mxu2 }
  0xb7   : > { %v783_v16 = vpack.c.bf16 %v504_v13, %v503_v12  ;;  %v437_v17 = vadd.f32 %v979_v1, %v436_v14  ;;  %v485_v18 = vpop.f32.mrf.mxu3 }
  0xb8   : > { %v419_v19 = vpop.f32.mrf.mxu0 }
  0xb9   : > { %784 = vst [vmem:[%s988_s4] sm:$0xff] %v783_v16   ;;  %v486_v20 = vadd.f32 %v485_v18, %v437_v17  ;;  %v468_v21 = vpop.f32.mrf.mxu1  ;;  %v420_v25 = vadd.f32 %v979_v1, %v419_v19 }
  0xbb   : > { %v512_v23 = vmax.f32 %v486_v20, 0.0  ;;  %v469_v29 = vadd.f32 %v468_v21, %v420_v25 }
  0xbd   : > { %v803_v24 = vpack.c.bf16 %v512_v23, %v511_v22  ;;  %v505_v34 = vmax.f32 %v469_v29, 0.0 }
  0xbe   : > { %v439_v26 = vpop.f32.mrf.mxu2 }
  0xbf   : > { %823 = vst [vmem:[%s988_s4 + $0x20] sm:$0xff] %v803_v24   ;;  %v488_v27 = vpop.f32.mrf.mxu3  ;;  %v440_v32 = vadd.f32 %v979_v1, %v439_v26 }
  0xc0   : > { %v421_v28 = vpop.f32.mrf.mxu0 }
  0xc1   : > { %v422_v30 = vadd.f32 %v979_v1, %v421_v28  ;;  %v470_v31 = vpop.f32.mrf.mxu1  ;;  %v489_v37 = vadd.f32 %v488_v27, %v440_v32 }
  0xc3   : > { %v471_v33 = vadd.f32 %v470_v31, %v422_v30  ;;  %v513_v44 = vmax.f32 %v489_v37, 0.0 }
  0xc5   : > { %v506_v35 = vmax.f32 %v471_v33, 0.0 }
  0xc6   : > { %v441_v36 = vpop.f32.mrf.mxu2 }
  0xc7   : > { %v788_v38 = vpack.c.bf16 %v506_v35, %v505_v34  ;;  %v442_v39 = vadd.f32 %v979_v1, %v441_v36  ;;  %v490_v40 = vpop.f32.mrf.mxu3 }
  0xc8   : > { %v424_v41 = vpop.f32.mrf.mxu0 }
  0xc9   : > { %820 = vst [vmem:[%s988_s4 + $0x8] sm:$0xff] %v788_v38   ;;  %v491_v42 = vadd.f32 %v490_v40, %v442_v39  ;;  %v473_v43 = vpop.f32.mrf.mxu1  ;;  %v425_v47 = vadd.f32 %v979_v1, %v424_v41 }
  0xcb   : > { %v514_v45 = vmax.f32 %v491_v42, 0.0  ;;  %v474_v51 = vadd.f32 %v473_v43, %v425_v47 }
  0xcd   : > { %v808_v46 = vpack.c.bf16 %v514_v45, %v513_v44  ;;  %v507_v56 = vmax.f32 %v474_v51, 0.0 }
  0xce   : > { %v444_v48 = vpop.f32.mrf.mxu2 }
  0xcf   : > { %824 = vst [vmem:[%s988_s4 + $0x28] sm:$0xff] %v808_v46   ;;  %v493_v49 = vpop.f32.mrf.mxu3  ;;  %v445_v54 = vadd.f32 %v979_v1, %v444_v48 }
  0xd0   : > { %v426_v50 = vpop.f32.mrf.mxu0 }
  0xd1   : > { %v427_v52 = vadd.f32 %v979_v1, %v426_v50  ;;  %v475_v53 = vpop.f32.mrf.mxu1  ;;  %v494_v59 = vadd.f32 %v493_v49, %v445_v54 }
  0xd3   : > { %v476_v55 = vadd.f32 %v475_v53, %v427_v52  ;;  %v515_v3 = vmax.f32 %v494_v59, 0.0 }
  0xd5   : > { %v508_v57 = vmax.f32 %v476_v55, 0.0 }
  0xd6   : > { %v446_v58 = vpop.f32.mrf.mxu2 }
  0xd7   : > { %v793_v60 = vpack.c.bf16 %v508_v57, %v507_v56  ;;  %v447_v61 = vadd.f32 %v979_v1, %v446_v58  ;;  %v495_v62 = vpop.f32.mrf.mxu3 }
  0xd8   : > { %v429_v63 = vpop.f32.mrf.mxu0 }
  0xd9   : > { %821 = vst [vmem:[%s988_s4 + $0x10] sm:$0xff] %v793_v60   ;;  %v496_v0 = vadd.f32 %v495_v62, %v447_v61  ;;  %v478_v2 = vpop.f32.mrf.mxu1  ;;  %v430_v6 = vadd.f32 %v979_v1, %v429_v63 }
  0xdb   : > { %v516_v4 = vmax.f32 %v496_v0, 0.0  ;;  %v479_v10 = vadd.f32 %v478_v2, %v430_v6 }
  0xdd   : > { %v813_v5 = vpack.c.bf16 %v516_v4, %v515_v3  ;;  %v509_v15 = vmax.f32 %v479_v10, 0.0 }
  0xde   : > { %v449_v7 = vpop.f32.mrf.mxu2 }
  0xdf   : > { %825 = vst [vmem:[%s988_s4 + $0x30] sm:$0xff] %v813_v5   ;;  %v498_v8 = vpop.f32.mrf.mxu3  ;;  %v450_v13 = vadd.f32 %v979_v1, %v449_v7 }
  0xe0   : > { %v431_v9 = vpop.f32.mrf.mxu0 }
  0xe1   : > { %v432_v11 = vadd.f32 %v979_v1, %v431_v9  ;;  %v480_v12 = vpop.f32.mrf.mxu1  ;;  %v499_v18 = vadd.f32 %v498_v8, %v450_v13 }
  0xe3   : > { %v481_v14 = vadd.f32 %v480_v12, %v432_v11  ;;  %v517_v23 = vmax.f32 %v499_v18, 0.0 }
  0xe5   : > { %v510_v16 = vmax.f32 %v481_v14, 0.0 }
  0xe6   : > { %v451_v17 = vpop.f32.mrf.mxu2 }
  0xe7   : > { %v798_v19 = vpack.c.bf16 %v510_v16, %v509_v15  ;;  %v452_v20 = vadd.f32 %v979_v1, %v451_v17  ;;  %v500_v21 = vpop.f32.mrf.mxu3 }
  0xe9   : > { %822 = vst [vmem:[%s988_s4 + $0x18] sm:$0xff] %v798_v19   ;;  %v501_v22 = vadd.f32 %v500_v21, %v452_v20 }
  0xeb   : > { %v518_v24 = vmax.f32 %v501_v22, 0.0 }
  0xed   : > { %v818_v25 = vpack.c.bf16 %v518_v24, %v517_v23 }
  0xef   : > { %826 = vst [vmem:[%s988_s4 + $0x38] sm:$0xff] %v818_v25  }
  0xf0 PF: > { %s13_s12 = sadd.s32 1, %s858_s12  }
  0xf1   : > { %p10_p4 = scmp.ge.s32.totalorder %s13_s12, 4  }
  0xf3   :  { %12 = sbr.rel (!%p10_p4) target bundleno = 1 (0x1), region = 62 }

// kernel: gcn_forward.7
= control target key start
LH: loop header
LB: loop body
LE: loop exit
PB: predicated region body
PF: predicated region fallthrough
CT: control target
= control target key end

     0   :  { %s1236_s12 = smov 0   ;;  %s1609_s0 = inlined_call_operand.vmem [shape: bf16[256,256], index: 0, kind: input, shape index: {}]   ;;  %s1610_s1 = inlined_call_operand.vmem [shape: bf16[256,128], index: 1, kind: input, shape index: {}]   ;;  %s1611_s2 = inlined_call_operand.vmem [shape: f32[1,128], index: 2, kind: input, shape index: {}]   ;;  %s1612_s3 = inlined_call_operand.vmem [shape: f32[256,128], index: 3, kind: output, shape index: {}]  }
   0x1 LB: > { %s946_s13 = sadd.s32 4294967295, %s1214_s12   ;;  %p950_p0 = scmp.ge.s32.totalorder %s1214_s12, 1  ;;  %s1214_s12 = sphi %s1236_s12, %s13_s12  }
   0x2   : > { %p139_p1 = scmp.lt.s32.totalorder %s1214_s12, 3 }
   0x4   : > { %p140_p2 = pnand %p950_p0, %p139_p1 }
   0x5   : > { %s951_s26 = sshll.u32 (!%p140_p2), %s946_s13, 4 }
   0x6   : > { %143 = sbr.rel (%p140_p2) target bundleno = 501 (0x1f5), region = 32  ;;  %p165_p3 = scmp.lt.s32.totalorder (!%p140_p2), %s951_s26, 31 }
   0xb   : > { %v1110_v0 = vld [vmem:[%s1610_s1 + $0x38] sm:$0xff]  ;;  %v1109_v2 = vld [vmem:[%s1610_s1 + $0x30] sm:$0xff]  ;;  %v1108_v4 = vld [vmem:[%s1610_s1 + $0x28] sm:$0xff]  ;;  %s1614_s26 = smov (!%p165_p3, %s951_s26), 31 }
   0xc   : > { %v1118_v1 = vld [vmem:[%s1610_s1 + $0x78] sm:$0xff]  ;;  %405 = vmatpush.bf16.msra.mxu0 %v1110_v0  ;;  %1119 = vmatpush.bf16.msra.mxu2 %v1110_v0  ;;  %v1117_v3 = vld [vmem:[%s1610_s1 + $0x70] sm:$0xff]  ;;  %v1116_v5 = vld [vmem:[%s1610_s1 + $0x68] sm:$0xff]  ;;  %s1086_s13 = sshll.u32 %s1614_s26, 3  ;;  %v503_v0 = vlaneseq }
   0xd   : > { %454 = vmatpush.bf16.msra.mxu1 %v1118_v1  ;;  %1127 = vmatpush.bf16.msra.mxu3 %v1118_v1  ;;  %v1107_v6 = vld [vmem:[%s1610_s1 + $0x20] sm:$0xff]  ;;  %v1106_v8 = vld [vmem:[%s1610_s1 + $0x18] sm:$0xff]  ;;  %v1105_v10 = vld [vmem:[%s1610_s1 + $0x10] sm:$0xff]  ;;  %s1291_s18 = scalar_lea.vmem %s1609_s0, %s1086_s13  ;;  %s1509_s30 = scalar_lea.vmem %s1612_s3, %s1086_s13 }
   0xe   : > { %v1115_v7 = vld [vmem:[%s1610_s1 + $0x60] sm:$0xff]  ;;  %v1114_v9 = vld [vmem:[%s1610_s1 + $0x58] sm:$0xff]  ;;  %v1113_v11 = vld [vmem:[%s1610_s1 + $0x50] sm:$0xff] }
   0xf   : > { %v1104_v12 = vld [vmem:[%s1610_s1 + $0x8] sm:$0xff]  ;;  %v1103_v14 = vld [vmem:[%s1610_s1] sm:$0xff]  ;;  %v966_v28 = vld [vmem:[%s1291_s18 + $0x10] sm:$0xf] }
  0x10   : > { %406 = vmatpush.bf16.msra.mxu0 %v1109_v2  ;;  %1120 = vmatpush.bf16.msra.mxu2 %v1109_v2  ;;  %v1112_v13 = vld [vmem:[%s1610_s1 + $0x48] sm:$0xff]  ;;  %v1111_v15 = vld [vmem:[%s1610_s1 + $0x40] sm:$0xff]  ;;  %v1090_v29 = vld [vmem:[%s1291_s18 + $0x14] sm:$0xf0]  ;;  %v1339_v2 = vand.u32 127, %v503_v0 }
  0x11   : > { %455 = vmatpush.bf16.msra.mxu1 %v1117_v3  ;;  %1128 = vmatpush.bf16.msra.mxu3 %v1117_v3  ;;  %v958_v16 = vld [vmem:[%s1291_s18] sm:$0xf]  ;;  %v1088_v17 = vld [vmem:[%s1291_s18 + $0x4] sm:$0xf0]  ;;  %v1087_v20 = vld [vmem:[%s1291_s18 + $0x4] sm:$0xf]  ;;  %v967_v36 = vor.u32 %v1090_v29, %v966_v28 }
  0x12   : > { %v990_v18 = vld [vmem:[%s1291_s18 + $0x40] sm:$0xf]  ;;  %v1096_v19 = vld [vmem:[%s1291_s18 + $0x44] sm:$0xf0]  ;;  %v960_v21 = vld [vmem:[%s1291_s18 + $0x8] sm:$0xf0]  ;;  %v959_v24 = vor.u32 %v1088_v17, %v958_v16 }
  0x13   : > { %v1095_v22 = vld [vmem:[%s1291_s18 + $0x44] sm:$0xf]  ;;  %v992_v23 = vld [vmem:[%s1291_s18 + $0x48] sm:$0xf0]  ;;  %v991_v25 = vor.u32 %v1096_v19, %v990_v18  ;;  %v963_v26 = vor.u32 %v1087_v20, %v960_v21  ;;  %v998_v30 = vld [vmem:[%s1291_s18 + $0x50] sm:$0xf] }
  0x14   : > { %407 = vmatpush.bf16.msra.mxu0 %v1108_v4  ;;  %1121 = vmatpush.bf16.msra.mxu2 %v1108_v4  ;;  %v995_v27 = vor.u32 %v1095_v22, %v992_v23  ;;  %v1098_v31 = vld [vmem:[%s1291_s18 + $0x54] sm:$0xf0]  ;;  %v1089_v32 = vld [vmem:[%s1291_s18 + $0x14] sm:$0xf]  ;;  %v968_v33 = vld [vmem:[%s1291_s18 + $0x18] sm:$0xf0] }
  0x15   : > { %456 = vmatpush.bf16.msra.mxu1 %v1116_v5  ;;  %1129 = vmatpush.bf16.msra.mxu3 %v1116_v5  ;;  %v1097_v34 = vld [vmem:[%s1291_s18 + $0x54] sm:$0xf]  ;;  %v1000_v35 = vld [vmem:[%s1291_s18 + $0x58] sm:$0xf0]  ;;  %v999_v37 = vor.u32 %v1098_v31, %v998_v30  ;;  %v971_v38 = vor.u32 %v1089_v32, %v968_v33  ;;  %v974_v40 = vld [vmem:[%s1291_s18 + $0x20] sm:$0xf] }
  0x16   : > { %v1003_v39 = vor.u32 %v1097_v34, %v1000_v35  ;;  %v1092_v41 = vld [vmem:[%s1291_s18 + $0x24] sm:$0xf0]  ;;  %v1006_v42 = vld [vmem:[%s1291_s18 + $0x60] sm:$0xf]  ;;  %v1091_v44 = vld [vmem:[%s1291_s18 + $0x24] sm:$0xf] }
  0x17   : > { %v1100_v43 = vld [vmem:[%s1291_s18 + $0x64] sm:$0xf0]  ;;  %v976_v45 = vld [vmem:[%s1291_s18 + $0x28] sm:$0xf0]  ;;  %v1099_v46 = vld [vmem:[%s1291_s18 + $0x64] sm:$0xf]  ;;  %v975_v48 = vor.u32 %v1092_v41, %v974_v40 }
  0x18   : > { %408 = vmatpush.bf16.msra.mxu0 %v1107_v6  ;;  %1122 = vmatpush.bf16.msra.mxu2 %v1107_v6  ;;  %v1008_v47 = vld [vmem:[%s1291_s18 + $0x68] sm:$0xf0]  ;;  %v1007_v49 = vor.u32 %v1100_v43, %v1006_v42  ;;  %v979_v50 = vor.u32 %v1091_v44, %v976_v45  ;;  %v982_v52 = vld [vmem:[%s1291_s18 + $0x30] sm:$0xf]  ;;  %v1094_v53 = vld [vmem:[%s1291_s18 + $0x34] sm:$0xf0] }
  0x19   : > { %457 = vmatpush.bf16.msra.mxu1 %v1115_v7  ;;  %1130 = vmatpush.bf16.msra.mxu3 %v1115_v7  ;;  %v1011_v51 = vor.u32 %v1099_v46, %v1008_v47  ;;  %v1014_v54 = vld [vmem:[%s1291_s18 + $0x70] sm:$0xf]  ;;  %v1102_v55 = vld [vmem:[%s1291_s18 + $0x74] sm:$0xf0]  ;;  %v1093_v56 = vld [vmem:[%s1291_s18 + $0x34] sm:$0xf]  ;;  %v983_v60 = vor.u32 %v1094_v53, %v982_v52 }
  0x1a   : > { %v984_v57 = vld [vmem:[%s1291_s18 + $0x38] sm:$0xf0]  ;;  %v1101_v58 = vld [vmem:[%s1291_s18 + $0x74] sm:$0xf]  ;;  %v1015_v61 = vor.u32 %v1102_v55, %v1014_v54  ;;  %v1337_v1 = vld [vmem:[%s1611_s2] ss:$0 sm:$0xff] }
  0x1b   : > { %v1016_v59 = vld [vmem:[%s1291_s18 + $0x78] sm:$0xf0]  ;;  %v987_v62 = vor.u32 %v1093_v56, %v984_v57  ;;  %vm505_vm0 = vcmp.lt.s32.totalorder %v1339_v2, 4 }
  0x1c   : > { %409 = vmatpush.bf16.msra.mxu0 %v1106_v8  ;;  %1123 = vmatpush.bf16.msra.mxu2 %v1106_v8  ;;  %v1019_v63 = vor.u32 %v1101_v58, %v1016_v59 }
  0x1d   : > { %458 = vmatpush.bf16.msra.mxu1 %v1114_v9  ;;  %1131 = vmatpush.bf16.msra.mxu3 %v1114_v9 }
  0x20   : > { %410 = vmatpush.bf16.msra.mxu0 %v1105_v10  ;;  %1124 = vmatpush.bf16.msra.mxu2 %v1105_v10 }
  0x21   : > { %459 = vmatpush.bf16.msra.mxu1 %v1113_v11  ;;  %1132 = vmatpush.bf16.msra.mxu3 %v1113_v11 }
  0x24   : > { %411 = vmatpush.bf16.msra.mxu0 %v1104_v12  ;;  %1125 = vmatpush.bf16.msra.mxu2 %v1104_v12 }
  0x25   : > { %460 = vmatpush.bf16.msra.mxu1 %v1112_v13  ;;  %1133 = vmatpush.bf16.msra.mxu3 %v1112_v13 }
  0x28   : > { %412 = vmatpush.bf16.msra.mxu0 %v1103_v14  ;;  %1126 = vmatpush.bf16.msra.mxu2 %v1103_v14 }
  0x29   : > { %461 = vmatpush.bf16.msra.mxu1 %v1111_v15  ;;  %1134 = vmatpush.bf16.msra.mxu3 %v1111_v15 }
  0x2b   : > { %413 = vmatmul.bf16.vlgmr.msra.gmra.mxu0 %v959_v24  ;;  %433 = vmatmul.bf16.vlgmr.msra.gmra.mxu2 %v991_v25 }
  0x2c   : > { %462 = vmatmul.bf16.vlgmr.msra.gmra.mxu1 %v963_v26  ;;  %482 = vmatmul.bf16.vlgmr.msra.gmra.mxu3 %v995_v27 }
  0x3b   : > { %418 = vmatmul.bf16.gmra.mxu0 %v967_v36  ;;  %438 = vmatmul.bf16.gmra.mxu2 %v999_v37 }
  0x3c   : > { %467 = vmatmul.bf16.gmra.mxu1 %v971_v38  ;;  %487 = vmatmul.bf16.gmra.mxu3 %v1003_v39 }
  0x4b   : > { %423 = vmatmul.bf16.gmra.mxu0 %v975_v48  ;;  %443 = vmatmul.bf16.gmra.mxu2 %v1007_v49 }
  0x4c   : > { %472 = vmatmul.bf16.gmra.mxu1 %v979_v50  ;;  %492 = vmatmul.bf16.gmra.mxu3 %v1011_v51 }
  0x5b   : > { %428 = vmatmul.bf16.gmra.mxu0 %v983_v60  ;;  %448 = vmatmul.bf16.gmra.mxu2 %v1015_v61 }
  0x5c   : > { %477 = vmatmul.bf16.gmra.mxu1 %v987_v62  ;;  %497 = vmatmul.bf16.gmra.mxu3 %v1019_v63 }
  0xa8   : > { %v414_v3 = vpop.f32.mrf.mxu0 }
  0xa9   : > { %v415_v4 = vadd.f32 %v1337_v1, %v414_v3  ;;  %v463_v5 = vpop.f32.mrf.mxu1 }
  0xab   : > { %v464_v6 = vadd.f32 %v463_v5, %v415_v4 }
  0xad   : > { %v1345_v7 = vsel %vm505_vm0, %v464_v6, -inf }
  0xae   : > { %v434_v8 = vpop.f32.mrf.mxu2  ;;  %522 = vmax.xlane.f32.xlu0 %v1345_v7 }
  0xaf   : > { %v435_v9 = vadd.f32 %v1337_v1, %v434_v8  ;;  %v483_v10 = vpop.f32.mrf.mxu3 }
  0xb0   : > { %v416_v11 = vpop.f32.mrf.mxu0 }
  0xb1   : > { %v484_v12 = vadd.f32 %v483_v10, %v435_v9  ;;  %v417_v13 = vadd.f32 %v1337_v1, %v416_v11  ;;  %v465_v14 = vpop.f32.mrf.mxu1 }
  0xb3   : > { %v466_v15 = vadd.f32 %v465_v14, %v417_v13  ;;  %v1352_v16 = vsel %vm505_vm0, %v484_v12, -inf }
  0xb4   : > { %538 = vmax.xlane.f32.xlu2 %v1352_v16 }
  0xb5   : > { %v1357_v17 = vsel %vm505_vm0, %v466_v15, -inf }
  0xb6   : > { %v436_v18 = vpop.f32.mrf.mxu2  ;;  %524 = vmax.xlane.f32.xlu0 %v1357_v17 }
  0xb7   : > { %v437_v19 = vadd.f32 %v1337_v1, %v436_v18  ;;  %v485_v20 = vpop.f32.mrf.mxu3 }
  0xb8   : > { %v419_v21 = vpop.f32.mrf.mxu0 }
  0xb9   : > { %v486_v22 = vadd.f32 %v485_v20, %v437_v19  ;;  %v420_v23 = vadd.f32 %v1337_v1, %v419_v21  ;;  %v468_v24 = vpop.f32.mrf.mxu1 }
  0xbb   : > { %v469_v25 = vadd.f32 %v468_v24, %v420_v23  ;;  %v1368_v27 = vsel %vm505_vm0, %v486_v22, -inf }
  0xbd   : > { %v1364_v26 = vsel %vm505_vm0, %v469_v25, -inf }
  0xbe   : > { %v439_v28 = vpop.f32.mrf.mxu2  ;;  %526 = vmax.xlane.f32.xlu1 %v1364_v26  ;;  %540 = vmax.xlane.f32.xlu0 %v1368_v27 }
  0xbf   : > { %v440_v29 = vadd.f32 %v1337_v1, %v439_v28  ;;  %v488_v30 = vpop.f32.mrf.mxu3 }
  0xc0   : > { %v421_v31 = vpop.f32.mrf.mxu0 }
  0xc1   : > { %v489_v32 = vadd.f32 %v488_v30, %v440_v29  ;;  %v470_v33 = vpop.f32.mrf.mxu1  ;;  %v422_v35 = vadd.f32 %v1337_v1, %v421_v31 }
  0xc3   : > { %v1375_v34 = vsel %vm505_vm0, %v489_v32, -inf  ;;  %v471_v40 = vadd.f32 %v470_v33, %v422_v35 }
  0xc5   : > { %v1388_v45 = vsel %vm505_vm0, %v471_v40, -inf }
  0xc6   : > { %v441_v36 = vpop.f32.mrf.mxu2  ;;  %542 = vmax.xlane.f32.xlu1 %v1375_v34 }
  0xc7   : > { %v442_v37 = vadd.f32 %v1337_v1, %v441_v36  ;;  %v490_v38 = vpop.f32.mrf.mxu3 }
  0xc8   : > { %v424_v39 = vpop.f32.mrf.mxu0 }
  0xc9   : > { %v491_v41 = vadd.f32 %v490_v38, %v442_v37  ;;  %v473_v42 = vpop.f32.mrf.mxu1  ;;  %v425_v43 = vadd.f32 %v1337_v1, %v424_v39 }
  0xcb   : > { %v1383_v44 = vsel %vm505_vm0, %v491_v41, -inf  ;;  %v474_v47 = vadd.f32 %v473_v42, %v425_v43 }
  0xcc   : > { %544 = vmax.xlane.f32.xlu2 %v1383_v44 }
  0xcd   : > { %v1395_v54 = vsel %vm505_vm0, %v474_v47, -inf }
  0xce   : > { %v444_v46 = vpop.f32.mrf.mxu2  ;;  %528 = vmax.xlane.f32.xlu1 %v1388_v45 }
  0xcf   : > { %v445_v48 = vadd.f32 %v1337_v1, %v444_v46  ;;  %v493_v49 = vpop.f32.mrf.mxu3 }
  0xd0   : > { %v426_v50 = vpop.f32.mrf.mxu0 }
  0xd1   : > { %v494_v51 = vadd.f32 %v493_v49, %v445_v48  ;;  %v475_v52 = vpop.f32.mrf.mxu1  ;;  %v427_v53 = vadd.f32 %v1337_v1, %v426_v50 }
  0xd3   : > { %v1399_v55 = vsel %vm505_vm0, %v494_v51, -inf  ;;  %v476_v57 = vadd.f32 %v475_v52, %v427_v53 }
  0xd4   : > { %530 = vmax.xlane.f32.xlu2 %v1395_v54  ;;  %546 = vmax.xlane.f32.xlu0 %v1399_v55 }
  0xd5   : > { %v1407_v3 = vsel %vm505_vm0, %v476_v57, -inf }
  0xd6   : > { %v446_v56 = vpop.f32.mrf.mxu2 }
  0xd7   : > { %v447_v58 = vadd.f32 %v1337_v1, %v446_v56  ;;  %v495_v59 = vpop.f32.mrf.mxu3 }
  0xd8   : > { %v429_v60 = vpop.f32.mrf.mxu0 }
  0xd9   : > { %v496_v61 = vadd.f32 %v495_v59, %v447_v58  ;;  %v430_v62 = vadd.f32 %v1337_v1, %v429_v60  ;;  %v478_v63 = vpop.f32.mrf.mxu1 }
  0xdb   : > { %v479_v0 = vadd.f32 %v478_v63, %v430_v62  ;;  %v1411_v4 = vsel %vm505_vm0, %v496_v61, -inf }
  0xdc   : > { %532 = vmax.xlane.f32.xlu2 %v1407_v3 }
  0xdd   : > { %v1416_v5 = vsel %vm505_vm0, %v479_v0, -inf }
  0xde   : > { %v449_v6 = vpop.f32.mrf.mxu2  ;;  %534 = vmax.xlane.f32.xlu0 %v1416_v5 }
  0xdf   : > { %v450_v8 = vadd.f32 %v1337_v1, %v449_v6  ;;  %v498_v9 = vpop.f32.mrf.mxu3 }
  0xe0   : > { %v431_v10 = vpop.f32.mrf.mxu0 }
  0xe1   : > { %v499_v11 = vadd.f32 %v498_v9, %v450_v8  ;;  %v432_v12 = vadd.f32 %v1337_v1, %v431_v10  ;;  %v480_v13 = vpop.f32.mrf.mxu1 }
  0xe3   : > { %v481_v14 = vadd.f32 %v480_v13, %v432_v12  ;;  %v1423_v15 = vsel %vm505_vm0, %v499_v11, -inf }
  0xe4   : > { %550 = vmax.xlane.f32.xlu2 %v1423_v15 }
  0xe5   : > { %v1428_v18 = vsel %vm505_vm0, %v481_v14, -inf }
  0xe6   : > { %v451_v19 = vpop.f32.mrf.mxu2  ;;  %536 = vmax.xlane.f32.xlu1 %v1428_v18 }
  0xe7   : > { %v452_v20 = vadd.f32 %v1337_v1, %v451_v19  ;;  %v500_v21 = vpop.f32.mrf.mxu3 }
  0xe9   : > { %v501_v22 = vadd.f32 %v500_v21, %v452_v20 }
  0xeb   : > { %v1434_v23 = vsel %vm505_vm0, %v501_v22, -inf }
  0xec   : > { %552 = vmax.xlane.f32.xlu0 %v1434_v23 }
  0xee   : > { %548 = vmax.xlane.f32.xlu1 %v1411_v4 }
 0x121   : > { %v523_v24 = vpop.xlane.xlu0 %522 }
 0x122   : > { %v554_v25 = vsub.f32 %v1345_v7, %v523_v24 }
 0x124   : > { %v570_v28 = vmul.f32 1.442695, %v554_v25 }
 0x126   : > { %1144 = vpow2.f32 %v570_v28 }
 0x127   : > { %v539_v29 = vpop.xlane.xlu2 %538 }
 0x128   : > { %v562_v30 = vsub.f32 %v1352_v16, %v539_v29 }
 0x129   : > { %v525_v31 = vpop.xlane.xlu0 %524 }
 0x12a   : > { %v586_v1 = vmul.f32 1.442695, %v562_v30  ;;  %v555_v32 = vsub.f32 %v1357_v17, %v525_v31 }
 0x12c   : > { %v1441_v33 = vpop.eup %1144  ;;  %1146 = vpow2.f32 %v586_v1  ;;  %v572_v2 = vmul.f32 1.442695, %v555_v32 }
 0x12d   : > { %602 = vadd.xlane.f32.xlu1 %v1441_v33 }
 0x12e   : > { %1148 = vpow2.f32 %v572_v2 }
 0x131   : > { %v527_v35 = vpop.xlane.xlu1 %526  ;;  %v541_v36 = vpop.xlane.xlu0 %540 }
 0x132   : > { %v1444_v37 = vpop.eup %1146  ;;  %v556_v7 = vsub.f32 %v1364_v26, %v527_v35  ;;  %v563_v38 = vsub.f32 %v1368_v27, %v541_v36 }
 0x133   : > { %618 = vadd.xlane.f32.xlu0 %v1444_v37 }
 0x134   : > { %v1449_v16 = vpop.eup %1148  ;;  %v574_v17 = vmul.f32 1.442695, %v556_v7  ;;  %v588_v39 = vmul.f32 1.442695, %v563_v38 }
 0x135   : > { %604 = vadd.xlane.f32.xlu2 %v1449_v16 }
 0x136   : > { %1150 = vpow2.f32 %v574_v17 }
 0x137   : > { %1152 = vpow2.f32 %v588_v39 }
 0x139   : > { %v543_v40 = vpop.xlane.xlu1 %542 }
 0x13a   : > { %v564_v41 = vsub.f32 %v1375_v34, %v543_v40 }
 0x13c   : > { %v1453_v42 = vpop.eup %1150  ;;  %v590_v43 = vmul.f32 1.442695, %v564_v41 }
 0x13d   : > { %v1455_v46 = vpop.eup %1152  ;;  %606 = vadd.xlane.f32.xlu0 %v1453_v42 }
 0x13e   : > { %1154 = vpow2.f32 %v590_v43  ;;  %620 = vadd.xlane.f32.xlu1 %v1455_v46 }
 0x13f   : > { %v545_v26 = vpop.xlane.xlu2 %544 }
 0x140   : > { %v565_v27 = vsub.f32 %v1383_v44, %v545_v26 }
 0x141   : > { %v529_v47 = vpop.xlane.xlu1 %528 }
 0x142   : > { %v592_v48 = vmul.f32 1.442695, %v565_v27  ;;  %v557_v49 = vsub.f32 %v1388_v45, %v529_v47 }
 0x144   : > { %v1461_v50 = vpop.eup %1154  ;;  %1156 = vpow2.f32 %v592_v48  ;;  %v576_v34 = vmul.f32 1.442695, %v557_v49 }
 0x145   : > { %622 = vadd.xlane.f32.xlu2 %v1461_v50 }
 0x146   : > { %1158 = vpow2.f32 %v576_v34 }
 0x147   : > { %v531_v51 = vpop.xlane.xlu2 %530  ;;  %v547_v52 = vpop.xlane.xlu0 %546 }
 0x148   : > { %v558_v53 = vsub.f32 %v1395_v54, %v531_v51  ;;  %v566_v56 = vsub.f32 %v1399_v55, %v547_v52 }
 0x14a   : > { %v1466_v57 = vpop.eup %1156  ;;  %v578_v44 = vmul.f32 1.442695, %v558_v53  ;;  %v594_v58 = vmul.f32 1.442695, %v566_v56 }
 0x14b   : > { %624 = vadd.xlane.f32.xlu0 %v1466_v57 }
 0x14c   : > { %v1469_v45 = vpop.eup %1158  ;;  %1160 = vpow2.f32 %v578_v44 }
 0x14d   : > { %608 = vadd.xlane.f32.xlu1 %v1469_v45  ;;  %1162 = vpow2.f32 %v594_v58 }
 0x14f   : > { %v533_v59 = vpop.xlane.xlu2 %532 }
 0x150   : > { %v559_v60 = vsub.f32 %v1407_v3, %v533_v59 }
 0x151   : > { %v535_v61 = vpop.xlane.xlu0 %534 }
 0x152   : > { %v1473_v62 = vpop.eup %1160  ;;  %v580_v54 = vmul.f32 1.442695, %v559_v60  ;;  %v560_v55 = vsub.f32 %v1416_v5, %v535_v61 }
 0x153   : > { %610 = vadd.xlane.f32.xlu2 %v1473_v62  ;;  %v1477_v63 = vpop.eup %1162 }
 0x154   : > { %1164 = vpow2.f32 %v580_v54  ;;  %v582_v0 = vmul.f32 1.442695, %v560_v55 }
 0x155   : > { %626 = vadd.xlane.f32.xlu1 %v1477_v63 }
 0x156   : > { %1166 = vpow2.f32 %v582_v0 }
 0x157   : > { %v551_v6 = vpop.xlane.xlu2 %550 }
 0x158   : > { %v568_v8 = vsub.f32 %v1423_v15, %v551_v6 }
 0x159   : > { %v537_v9 = vpop.xlane.xlu1 %536 }
 0x15a   : > { %v1481_v3 = vpop.eup %1164  ;;  %v598_v10 = vmul.f32 1.442695, %v568_v8  ;;  %v561_v11 = vsub.f32 %v1428_v18, %v537_v9 }
 0x15b   : > { %612 = vadd.xlane.f32.xlu0 %v1481_v3 }
 0x15c   : > { %v1485_v5 = vpop.eup %1166  ;;  %1168 = vpow2.f32 %v598_v10  ;;  %v584_v12 = vmul.f32 1.442695, %v561_v11 }
 0x15d   : > { %614 = vadd.xlane.f32.xlu1 %v1485_v5 }
 0x15e   : > { %1170 = vpow2.f32 %v584_v12 }
 0x15f   : > { %v553_v13 = vpop.xlane.xlu0 %552 }
 0x160   : > { %v569_v14 = vsub.f32 %v1434_v23, %v553_v13 }
 0x161   : > { %v549_v19 = vpop.xlane.xlu1 %548 }
 0x162   : > { %v1489_v15 = vpop.eup %1168  ;;  %v600_v20 = vmul.f32 1.442695, %v569_v14  ;;  %v567_v21 = vsub.f32 %v1411_v4, %v549_v19 }
 0x163   : > { %630 = vadd.xlane.f32.xlu0 %v1489_v15 }
 0x164   : > { %v1493_v18 = vpop.eup %1170  ;;  %1172 = vpow2.f32 %v600_v20  ;;  %v596_v22 = vmul.f32 1.442695, %v567_v21 }
 0x165   : > { %616 = vadd.xlane.f32.xlu2 %v1493_v18 }
 0x166   : > { %1174 = vpow2.f32 %v596_v22 }
 0x16a   : > { %v1496_v24 = vpop.eup %1172 }
 0x16b   : > { %632 = vadd.xlane.f32.xlu1 %v1496_v24 }
 0x16c   : > { %v1499_v23 = vpop.eup %1174 }
 0x16d   : > { %628 = vadd.xlane.f32.xlu2 %v1499_v23 }
 0x1a0   : > { %v603_v25 = vpop.xlane.xlu1 %602 }
 0x1a1   : > { %1176 = vrcp.f32 %v603_v25  ;;  %v643_v1 = vand.u32 2147483647, %v603_v25  ;;  %v645_v32 = vand.u32 2147483648, %v603_v25  ;;  %vm639_vm2 = vweird.f32 %v603_v25 }
 0x1a3   : > { %vm644_vm4 = vcmp.eq.f32.partialorder %v643_v1, 8.507059e+37  ;;  %v646_v17 = vor.u32 1.1754944e-38, %v645_v32 }
 0x1a6   : > { %v619_v4 = vpop.xlane.xlu0 %618 }
 0x1a7   : > { %v1177_v28 = vpop.eup %1176  ;;  %1178 = vrcp.f32 %v619_v4  ;;  %v763_v41 = vand.u32 2147483647, %v619_v4  ;;  %v765_v47 = vand.u32 2147483648, %v619_v4  ;;  %vm759_vm6 = vweird.f32 %v619_v4 }
 0x1a8   : > { %v635_v29 = vmul.f32 %v1177_v28, %v603_v25  ;;  %v605_v30 = vpop.xlane.xlu2 %604  ;;  %vm640_vm1 = vweird.f32 %v1177_v28 }
 0x1a9   : > { %1180 = vrcp.f32 %v605_v30  ;;  %vm641_vm3 = vmor %vm639_vm2, %vm640_vm1  ;;  %v660_v52 = vand.u32 2147483648, %v605_v30  ;;  %v658_v44 = vand.u32 2147483647, %v605_v30  ;;  %v766_v58 = vor.u32 1.1754944e-38, %v765_v47 }
 0x1aa   : > { %v636_v31 = vsub.f32 1.0, %v635_v29  ;;  %vm764_vm9 = vcmp.eq.f32.partialorder %v763_v41, 8.507059e+37  ;;  %vm654_vm10 = vweird.f32 %v605_v30 }
 0x1ab   : > { %v661_v54 = vor.u32 1.1754944e-38, %v660_v52  ;;  %vm659_vm12 = vcmp.eq.f32.partialorder %v658_v44, 8.507059e+37 }
 0x1ac   : > { %v637_v2 = vmul.f32 %v1177_v28, %v636_v31 }
 0x1ad   : > { %v1179_v35 = vpop.eup %1178 }
 0x1ae   : > { %v638_v36 = vadd.f32 %v1177_v28, %v637_v2  ;;  %v755_v7 = vmul.f32 %v1179_v35, %v619_v4  ;;  %vm760_vm5 = vweird.f32 %v1179_v35 }
 0x1af   : > { %v1181_v38 = vpop.eup %1180  ;;  %vm761_vm8 = vmor %vm759_vm6, %vm760_vm5 }
 0x1b0   : > { %v642_v39 = vsel %vm641_vm3, %v1177_v28, %v638_v36  ;;  %v756_v40 = vsub.f32 1.0, %v755_v7  ;;  %v650_v43 = vmul.f32 %v1181_v38, %v605_v30  ;;  %v1502_v26 = vpop.xlane.xlu0 %606  ;;  %vm655_vm7 = vweird.f32 %v1181_v38 }
 0x1b1   : > { %v647_v27 = vsel %vm644_vm4, %v646_v17, %v642_v39  ;;  %v621_v48 = vpop.xlane.xlu1 %620  ;;  %1182 = vrcp.f32 %v1502_v26  ;;  %vm656_vm11 = vmor %vm654_vm10, %vm655_vm7  ;;  %v675_v19 = vand.u32 2147483648, %v1502_v26  ;;  %vm669_vm15 = vweird.f32 %v1502_v26 }
 0x1b2   : > { %v648_v49 = vmul.f32 %v1441_v33, %v647_v27  ;;  %v757_v34 = vmul.f32 %v1179_v35, %v756_v40  ;;  %v651_v51 = vsub.f32 1.0, %v650_v43  ;;  %1184 = vrcp.f32 %v621_v48 }
 0x1b3   : > { %v780_v20 = vand.u32 2147483648, %v621_v48  ;;  %v778_v25 = vand.u32 2147483647, %v621_v48  ;;  %vm774_vm0 = vweird.f32 %v621_v48 }
 0x1b4   : > { %874 = vst [vmem:[%s1509_s30] sm:$0xff] %v648_v49  ;;  %v758_v53 = vadd.f32 %v1179_v35, %v757_v34  ;;  %v652_v56 = vmul.f32 %v1181_v38, %v651_v51 }
 0x1b5   : > { %v781_v31 = vor.u32 1.1754944e-38, %v780_v20  ;;  %vm779_vm4 = vcmp.eq.f32.partialorder %v778_v25, 8.507059e+37 }
 0x1b6   : > { %v762_v59 = vsel %vm761_vm8, %v1179_v35, %v758_v53  ;;  %v653_v60 = vadd.f32 %v1181_v38, %v652_v56 }
 0x1b7   : > { %v1183_v61 = vpop.eup %1182  ;;  %v767_v33 = vsel %vm764_vm9, %v766_v58, %v762_v59 }
 0x1b8   : > { %v1185_v55 = vpop.eup %1184  ;;  %v768_v0 = vmul.f32 %v1444_v37, %v767_v33  ;;  %v657_v6 = vsel %vm656_vm11, %v1181_v38, %v653_v60  ;;  %v665_v8 = vmul.f32 %v1183_v61, %v1502_v26  ;;  %v623_v9 = vpop.xlane.xlu2 %622  ;;  %vm670_vm13 = vweird.f32 %v1183_v61 }
 0x1b9   : > { %v662_v10 = vsel %vm659_vm12, %v661_v54, %v657_v6  ;;  %v770_v11 = vmul.f32 %v1185_v55, %v621_v48  ;;  %1186 = vrcp.f32 %v623_v9  ;;  %v673_v37 = vand.u32 2147483647, %v1502_v26  ;;  %vm671_vm1 = vmor %vm669_vm15, %vm670_vm13 }
 0x1ba   : > { %882 = vst [vmem:[%s1509_s30 + $0x40] sm:$0xff] %v768_v0  ;;  %v663_v12 = vmul.f32 %v1449_v16, %v662_v10  ;;  %v666_v13 = vsub.f32 1.0, %v665_v8  ;;  %vm775_vm14 = vweird.f32 %v1185_v55  ;;  %v676_v16 = vor.u32 1.1754944e-38, %v675_v19 }
 0x1bb   : > { %v771_v14 = vsub.f32 1.0, %v770_v11  ;;  %vm776_vm2 = vmor %vm774_vm0, %vm775_vm14  ;;  %vm674_vm3 = vcmp.eq.f32.partialorder %v673_v37, 8.507059e+37  ;;  %v795_v40 = vand.u32 2147483648, %v623_v9  ;;  %v793_v43 = vand.u32 2147483647, %v623_v9 }
 0x1bc   : > { %875 = vst [vmem:[%s1509_s30 + $0x8] sm:$0xff] %v663_v12  ;;  %v667_v21 = vmul.f32 %v1183_v61, %v666_v13  ;;  %vm789_vm6 = vweird.f32 %v623_v9 }
 0x1bd   : > { %v772_v22 = vmul.f32 %v1185_v55, %v771_v14  ;;  %v796_v34 = vor.u32 1.1754944e-38, %v795_v40  ;;  %vm794_vm8 = vcmp.eq.f32.partialorder %v793_v43, 8.507059e+37 }
 0x1be   : > { %v668_v4 = vadd.f32 %v1183_v61, %v667_v21  ;;  %v625_v28 = vpop.xlane.xlu0 %624 }
 0x1bf   : > { %v1187_v29 = vpop.eup %1186  ;;  %v773_v30 = vadd.f32 %v1185_v55, %v772_v22  ;;  %1188 = vrcp.f32 %v625_v28  ;;  %v808_v56 = vand.u32 2147483647, %v625_v28  ;;  %v810_v44 = vand.u32 2147483648, %v625_v28 }
 0x1c0   : > { %v672_v1 = vsel %vm671_vm1, %v1183_v61, %v668_v4  ;;  %v785_v32 = vmul.f32 %v1187_v29, %v623_v9  ;;  %v609_v2 = vpop.xlane.xlu1 %608  ;;  %vm790_vm5 = vweird.f32 %v1187_v29  ;;  %vm804_vm10 = vweird.f32 %v625_v28 }
 0x1c1   : > { %v777_v35 = vsel %vm776_vm2, %v1185_v55, %v773_v30  ;;  %v677_v36 = vsel %vm674_vm3, %v676_v16, %v672_v1  ;;  %1190 = vrcp.f32 %v609_v2  ;;  %vm791_vm7 = vmor %vm789_vm6, %vm790_vm5  ;;  %v688_v61 = vand.u32 2147483647, %v609_v2 }
 0x1c2   : > { %v782_v7 = vsel %vm779_vm4, %v781_v31, %v777_v35  ;;  %v678_v38 = vmul.f32 %v1453_v42, %v677_v36  ;;  %v786_v17 = vsub.f32 1.0, %v785_v32  ;;  %v690_v33 = vand.u32 2147483648, %v609_v2 }
 0x1c3   : > { %v783_v39 = vmul.f32 %v1455_v46, %v782_v7  ;;  %vm809_vm13 = vcmp.eq.f32.partialorder %v808_v56, 8.507059e+37  ;;  %v811_v6 = vor.u32 1.1754944e-38, %v810_v44  ;;  %vm684_vm14 = vweird.f32 %v609_v2 }
 0x1c4   : > { %876 = vst [vmem:[%s1509_s30 + $0x10] sm:$0xff] %v678_v38  ;;  %v787_v41 = vmul.f32 %v1187_v29, %v786_v17  ;;  %vm689_vm0 = vcmp.eq.f32.partialorder %v688_v61, 8.507059e+37  ;;  %v691_v13 = vor.u32 1.1754944e-38, %v690_v33 }
 0x1c5   : > { %v1189_v26 = vpop.eup %1188  ;;  %883 = vst [vmem:[%s1509_s30 + $0x48] sm:$0xff] %v783_v39 }
 0x1c6   : > { %v788_v27 = vadd.f32 %v1187_v29, %v787_v41  ;;  %v800_v47 = vmul.f32 %v1189_v26, %v625_v28  ;;  %v1527_v48 = vpop.xlane.xlu2 %610  ;;  %vm805_vm9 = vweird.f32 %v1189_v26 }
 0x1c7   : > { %v1191_v49 = vpop.eup %1190  ;;  %1192 = vrcp.f32 %v1527_v48  ;;  %vm806_vm12 = vmor %vm804_vm10, %vm805_vm9  ;;  %v703_v25 = vand.u32 2147483647, %v1527_v48  ;;  %v705_v4 = vand.u32 2147483648, %v1527_v48  ;;  %vm699_vm2 = vweird.f32 %v1527_v48 }
 0x1c8   : > { %v792_v42 = vsel %vm791_vm7, %v1187_v29, %v788_v27  ;;  %v801_v46 = vsub.f32 1.0, %v800_v47  ;;  %v680_v51 = vmul.f32 %v1191_v49, %v609_v2  ;;  %v1530_v52 = vpop.xlane.xlu1 %626  ;;  %vm685_vm11 = vweird.f32 %v1191_v49 }
 0x1c9   : > { %v797_v53 = vsel %vm794_vm8, %v796_v34, %v792_v42  ;;  %1194 = vrcp.f32 %v1530_v52  ;;  %vm686_vm15 = vmor %vm684_vm14, %vm685_vm11  ;;  %v823_v1 = vand.u32 2147483647, %v1530_v52  ;;  %vm704_vm5 = vcmp.eq.f32.partialorder %v703_v25, 8.507059e+37 }
 0x1ca   : > { %v798_v58 = vmul.f32 %v1461_v50, %v797_v53  ;;  %v802_v59 = vmul.f32 %v1189_v26, %v801_v46  ;;  %v681_v60 = vsub.f32 1.0, %v680_v51  ;;  %v706_v2 = vor.u32 1.1754944e-38, %v705_v4 }
 0x1cb   : > { %vm819_vm6 = vweird.f32 %v1530_v52  ;;  %vm824_vm8 = vcmp.eq.f32.partialorder %v823_v1, 8.507059e+37 }
 0x1cc   : > { %884 = vst [vmem:[%s1509_s30 + $0x50] sm:$0xff] %v798_v58  ;;  %v803_v54 = vadd.f32 %v1189_v26, %v802_v59  ;;  %v682_v55 = vmul.f32 %v1191_v49, %v681_v60 }
 0x1cd   : > { %v1193_v0 = vpop.eup %1192 }
 0x1ce   : > { %v807_v8 = vsel %vm806_vm12, %v1189_v26, %v803_v54  ;;  %v683_v9 = vadd.f32 %v1191_v49, %v682_v55  ;;  %v695_v10 = vmul.f32 %v1193_v0, %v1527_v48  ;;  %v1536_v50 = vpop.xlane.xlu0 %612  ;;  %vm700_vm1 = vweird.f32 %v1193_v0 }
 0x1cf   : > { %v1195_v11 = vpop.eup %1194  ;;  %v812_v12 = vsel %vm809_vm13, %v811_v6, %v807_v8  ;;  %1196 = vrcp.f32 %v1536_v50  ;;  %vm701_vm4 = vmor %vm699_vm2, %vm700_vm1  ;;  %v718_v47 = vand.u32 2147483647, %v1536_v50  ;;  %v720_v48 = vand.u32 2147483648, %v1536_v50 }
 0x1d0   : > { %v813_v14 = vmul.f32 %v1466_v57, %v812_v12  ;;  %v687_v19 = vsel %vm686_vm15, %v1191_v49, %v683_v9  ;;  %v696_v20 = vsub.f32 1.0, %v695_v10  ;;  %v815_v21 = vmul.f32 %v1195_v11, %v1530_v52  ;;  %v1541_v37 = vpop.xlane.xlu1 %614 }
 0x1d1   : > { %v692_v22 = vsel %vm689_vm0, %v691_v13, %v687_v19  ;;  %1198 = vrcp.f32 %v1541_v37  ;;  %v825_v57 = vand.u32 2147483648, %v1530_v52  ;;  %vm820_vm3 = vweird.f32 %v1195_v11 }
 0x1d2   : > { %885 = vst [vmem:[%s1509_s30 + $0x58] sm:$0xff] %v813_v14  ;;  %v693_v28 = vmul.f32 %v1469_v45, %v692_v22  ;;  %v697_v29 = vmul.f32 %v1193_v0, %v696_v20  ;;  %v816_v30 = vsub.f32 1.0, %v815_v21  ;;  %vm821_vm7 = vmor %vm819_vm6, %vm820_vm3  ;;  %vm714_vm10 = vweird.f32 %v1536_v50 }
 0x1d3   : > { %v826_v17 = vor.u32 1.1754944e-38, %v825_v57  ;;  %v733_v51 = vand.u32 2147483647, %v1541_v37  ;;  %v735_v52 = vand.u32 2147483648, %v1541_v37  ;;  %v721_v56 = vor.u32 1.1754944e-38, %v720_v48 }
 0x1d4   : > { %877 = vst [vmem:[%s1509_s30 + $0x18] sm:$0xff] %v693_v28  ;;  %v698_v16 = vadd.f32 %v1193_v0, %v697_v29  ;;  %v817_v31 = vmul.f32 %v1195_v11, %v816_v30  ;;  %vm719_vm13 = vcmp.eq.f32.partialorder %v718_v47, 8.507059e+37  ;;  %vm729_vm14 = vweird.f32 %v1541_v37 }
 0x1d5   : > { %v1197_v32 = vpop.eup %1196  ;;  %vm734_vm0 = vcmp.eq.f32.partialorder %v733_v51, 8.507059e+37  ;;  %v736_v55 = vor.u32 1.1754944e-38, %v735_v52 }
 0x1d6   : > { %v702_v45 = vsel %vm701_vm4, %v1193_v0, %v698_v16  ;;  %v818_v35 = vadd.f32 %v1195_v11, %v817_v31  ;;  %v710_v36 = vmul.f32 %v1197_v32, %v1536_v50  ;;  %v1555_v7 = vpop.xlane.xlu0 %630  ;;  %vm715_vm9 = vweird.f32 %v1197_v32 }
 0x1d7   : > { %v707_v38 = vsel %vm704_vm5, %v706_v2, %v702_v45  ;;  %1200 = vrcp.f32 %v1555_v7  ;;  %v1199_v39 = vpop.eup %1198  ;;  %vm716_vm11 = vmor %vm714_vm10, %vm715_vm9  ;;  %v855_v9 = vand.u32 2147483648, %v1555_v7  ;;  %vm849_vm2 = vweird.f32 %v1555_v7 }
 0x1d8   : > { %v708_v40 = vmul.f32 %v1473_v62, %v707_v38  ;;  %v822_v41 = vsel %vm821_vm7, %v1195_v11, %v818_v35  ;;  %v711_v43 = vsub.f32 1.0, %v710_v36  ;;  %v1559_v26 = vpop.xlane.xlu2 %616  ;;  %v725_v49 = vmul.f32 %v1199_v39, %v1541_v37 }
 0x1d9   : > { %v827_v27 = vsel %vm824_vm8, %v826_v17, %v822_v41  ;;  %1202 = vrcp.f32 %v1559_v26  ;;  %vm730_vm12 = vweird.f32 %v1199_v39  ;;  %v750_v19 = vand.u32 2147483648, %v1559_v26 }
 0x1da   : > { %878 = vst [vmem:[%s1509_s30 + $0x20] sm:$0xff] %v708_v40  ;;  %v828_v34 = vmul.f32 %v1477_v63, %v827_v27  ;;  %v712_v42 = vmul.f32 %v1197_v32, %v711_v43  ;;  %v726_v62 = vsub.f32 1.0, %v725_v49  ;;  %vm731_vm15 = vmor %vm729_vm14, %vm730_vm12  ;;  %v856_v21 = vor.u32 1.1754944e-38, %v855_v9 }
 0x1db   : > { %v748_v22 = vand.u32 2147483647, %v1559_v26  ;;  %vm744_vm6 = vweird.f32 %v1559_v26  ;;  %v751_v57 = vor.u32 1.1754944e-38, %v750_v19 }
 0x1dc   : > { %886 = vst [vmem:[%s1509_s30 + $0x60] sm:$0xff] %v828_v34  ;;  %v713_v46 = vadd.f32 %v1197_v32, %v712_v42  ;;  %v727_v44 = vmul.f32 %v1199_v39, %v726_v62 }
 0x1dd   : > { %v1201_v53 = vpop.eup %1200  ;;  %vm749_vm8 = vcmp.eq.f32.partialorder %v748_v22, 8.507059e+37 }
 0x1de   : > { %v717_v58 = vsel %vm716_vm11, %v1197_v32, %v713_v46  ;;  %v845_v63 = vmul.f32 %v1201_v53, %v1555_v7  ;;  %v1572_v59 = vpop.xlane.xlu1 %632  ;;  %v728_v61 = vadd.f32 %v1199_v39, %v727_v44  ;;  %vm850_vm1 = vweird.f32 %v1201_v53 }
 0x1df   : > { %v722_v60 = vsel %vm719_vm13, %v721_v56, %v717_v58  ;;  %1204 = vrcp.f32 %v1572_v59  ;;  %v1203_v33 = vpop.eup %1202  ;;  %vm851_vm3 = vmor %vm849_vm2, %vm850_vm1  ;;  %v868_v32 = vand.u32 2147483647, %v1572_v59  ;;  %v870_v2 = vand.u32 2147483648, %v1572_v59 }
 0x1e0   : > { %v723_v54 = vmul.f32 %v1481_v3, %v722_v60  ;;  %v846_v0 = vsub.f32 1.0, %v845_v63  ;;  %v1577_v6 = vpop.xlane.xlu2 %628  ;;  %v732_v8 = vsel %vm731_vm15, %v1199_v39, %v728_v61  ;;  %v740_v10 = vmul.f32 %v1203_v33, %v1559_v26 }
 0x1e1   : > { %1206 = vrcp.f32 %v1577_v6  ;;  %v737_v50 = vsel %vm734_vm0, %v736_v55, %v732_v8  ;;  %v853_v3 = vand.u32 2147483647, %v1555_v7  ;;  %vm745_vm4 = vweird.f32 %v1203_v33 }
 0x1e2   : > { %879 = vst [vmem:[%s1509_s30 + $0x28] sm:$0xff] %v723_v54  ;;  %v847_v11 = vmul.f32 %v1201_v53, %v846_v0  ;;  %v738_v12 = vmul.f32 %v1485_v5, %v737_v50  ;;  %v741_v13 = vsub.f32 1.0, %v740_v10  ;;  %vm746_vm7 = vmor %vm744_vm6, %vm745_vm4  ;;  %vm864_vm10 = vweird.f32 %v1572_v59 }
 0x1e3   : > { %vm854_vm5 = vcmp.eq.f32.partialorder %v853_v3, 8.507059e+37  ;;  %v838_v39 = vand.u32 2147483647, %v1577_v6  ;;  %v871_v40 = vor.u32 1.1754944e-38, %v870_v2  ;;  %vm869_vm13 = vcmp.eq.f32.partialorder %v868_v32, 8.507059e+37 }
 0x1e4   : > { %v848_v14 = vadd.f32 %v1201_v53, %v847_v11  ;;  %880 = vst [vmem:[%s1509_s30 + $0x30] sm:$0xff] %v738_v12  ;;  %v742_v37 = vmul.f32 %v1203_v33, %v741_v13  ;;  %vm834_vm14 = vweird.f32 %v1577_v6 }
 0x1e5   : > { %v1205_v20 = vpop.eup %1204  ;;  %vm839_vm0 = vcmp.eq.f32.partialorder %v838_v39, 8.507059e+37 }
 0x1e6   : > { %v852_v25 = vsel %vm851_vm3, %v1201_v53, %v848_v14  ;;  %v860_v4 = vmul.f32 %v1205_v20, %v1572_v59  ;;  %v743_v29 = vadd.f32 %v1203_v33, %v742_v37  ;;  %vm865_vm9 = vweird.f32 %v1205_v20 }
 0x1e7   : > { %v1207_v5 = vpop.eup %1206  ;;  %v857_v28 = vsel %vm854_vm5, %v856_v21, %v852_v25  ;;  %vm866_vm12 = vmor %vm864_vm10, %vm865_vm9 }
 0x1e8   : > { %v858_v30 = vmul.f32 %v1489_v15, %v857_v28  ;;  %v861_v16 = vsub.f32 1.0, %v860_v4  ;;  %v830_v31 = vmul.f32 %v1207_v5, %v1577_v6  ;;  %v747_v1 = vsel %vm746_vm7, %v1203_v33, %v743_v29 }
 0x1e9   : > { %v752_v45 = vsel %vm749_vm8, %v751_v57, %v747_v1  ;;  %v840_v15 = vand.u32 2147483648, %v1577_v6  ;;  %vm835_vm11 = vweird.f32 %v1207_v5 }
 0x1ea   : > { %888 = vst [vmem:[%s1509_s30 + $0x70] sm:$0xff] %v858_v30  ;;  %v862_v35 = vmul.f32 %v1205_v20, %v861_v16  ;;  %v831_v36 = vsub.f32 1.0, %v830_v31  ;;  %v753_v7 = vmul.f32 %v1493_v18, %v752_v45  ;;  %vm836_vm15 = vmor %vm834_vm14, %vm835_vm11 }
 0x1eb   : > { %v841_v26 = vor.u32 1.1754944e-38, %v840_v15 }
 0x1ec   : > { %v863_v38 = vadd.f32 %v1205_v20, %v862_v35  ;;  %v832_v17 = vmul.f32 %v1207_v5, %v831_v36  ;;  %881 = vst [vmem:[%s1509_s30 + $0x38] sm:$0xff] %v753_v7 }
 0x1ee   : > { %v867_v41 = vsel %vm866_vm12, %v1205_v20, %v863_v38  ;;  %v833_v43 = vadd.f32 %v1207_v5, %v832_v17 }
 0x1ef   : > { %v872_v18 = vsel %vm869_vm13, %v871_v40, %v867_v41 }
 0x1f0   : > { %v873_v27 = vmul.f32 %v1496_v24, %v872_v18  ;;  %v837_v47 = vsel %vm836_vm15, %v1207_v5, %v833_v43 }
 0x1f1   : > { %v842_v48 = vsel %vm839_vm0, %v841_v26, %v837_v47 }
 0x1f2   : > { %889 = vst [vmem:[%s1509_s30 + $0x78] sm:$0xff] %v873_v27  ;;  %v843_v49 = vmul.f32 %v1499_v23, %v842_v48 }
 0x1f4   : > { %887 = vst [vmem:[%s1509_s30 + $0x68] sm:$0xff] %v843_v49 }
 0x1f5 PF: > { %s13_s12 = sadd.s32 1, %s1214_s12  }
 0x1f6   : > { %p10_p4 = scmp.ge.s32.totalorder %s13_s12, 4  }
 0x1f8   :  { %12 = sbr.rel (!%p10_p4) target bundleno = 1 (0x1), region = 62 }

</bundles_post_ra>
